<compile_context>
chip_gen: v7x
topology: tpu7x:2x2x1
jax: 0.10.0
libtpu: 0.0.40
codegen_flags: <defaults>
</compile_context>

<pallas_src>
import jax
import jax.numpy as jnp
from jax.experimental import pallas as pl
from jax.experimental.pallas import tpu as pltpu


# ----------------------------- Pallas kernel ------------------------------ #

def lstm_model_kernel(x_ref,                 # (T*B, D)  time-major flattened input
                      w01_ref, b01_ref,      # (D, 4H), (1, 4H)  fused emb + layer-0 input proj
                      w_hh0_ref,             # (H, 4H)           layer-0 recurrent
                      w_cat1_ref, b1_ref,    # (2H, 4H), (1, 4H) layer-1 [W_ih ; W_hh] fused
                      w_out_ref, b_out_ref,  # (H, D), (1, D)
                      out_ref,               # (B, D)
                      state_ref):            # (4B, H) = [h0 ; h1 ; c0 ; c1] rows
    H = w_hh0_ref.shape[0]
    G = 4 * H
    B = out_ref.shape[0]
    T = x_ref.shape[0] // B

    # ---- hoisted: embedding + layer-0 input projection for ALL timesteps ----
    # One (T*B, D) x (D, 4H) MXU op; emb bias folded through W_ih0 and
    # b_ih0 + b_hh0 already folded into b01.  Stays in vregs; sliced per step.
    gates0_x = (jnp.dot(x_ref[...], w01_ref[...],
                        preferred_element_type=jnp.float32) + b01_ref[...])

    # Pin the small recurrent weights in vregs; hoist the bias broadcast
    # (JAX does not CSE broadcast_in_dim).
    w_hh0 = w_hh0_ref[...]
    w_cat1 = w_cat1_ref[...]
    b1 = jnp.broadcast_to(b1_ref[...], (B, G))

    def gate_act(gates, c):
        # Activate the full (B, 4H) = 128-lane value (2 EUP pushes instead of
        # 4), then slice the i/f/g/o bands.  PyTorch gate order: i, f, g, o.
        sig = jax.nn.sigmoid(gates)
        tnh = jnp.tanh(gates)
        i = sig[:, 0 * H:1 * H]
        f = sig[:, 1 * H:2 * H]
        g = tnh[:, 2 * H:3 * H]
        o = sig[:, 3 * H:4 * H]
        c_new = f * c + i * g
        h_new = o * jnp.tanh(c_new)
        return h_new, c_new

    # init_hidden: h = c = 0 for both layers.
    zeros = jnp.zeros((B, H), jnp.float32)
    h0 = c0 = h1 = c1 = zeros

    # Statically unrolled recurrence (T is small and fixed); all slice offsets
    # are compile-time constants.  2 MXU matmuls per step on the serial chain.
    for t in range(T):
        # Layer 0: only the recurrent matmul remains on the critical path.
        g0 = gates0_x[t * B:(t + 1) * B, :] + jnp.dot(
            h0, w_hh0, preferred_element_type=jnp.float32)
        h0, c0 = gate_act(g0, c0)
        # Layer 1: fused [h0_t ; h1_prev] @ [W_ih ; W_hh] -> one MXU op (K = 2H).
        xh = jnp.concatenate([h0, h1], axis=-1)                    # (B, 2H)
        g1 = jnp.dot(xh, w_cat1, preferred_element_type=jnp.float32) + b1
        h1, c1 = gate_act(g1, c1)

    # out_layer applied to output[:, -1, :]  (== h1 at the last step)
    out_ref[...] = (jnp.dot(h1, w_out_ref[...],
                            preferred_element_type=jnp.float32) + b_out_ref[...])
    # Single consolidated state slab: [h0 ; h1 ; c0 ; c1] along rows.
    state_ref[...] = jnp.concatenate([h0, h1, c0, c1], axis=0)


# ------------------------------ JAX wrapper -------------------------------- #

def init_params(key, input_dim, rnn_unit):
    """Deterministic PyTorch-style uniform(-k, k) initialization."""
    D, H = input_dim, rnn_unit
    keys = jax.random.split(key, 14)
    ki = 0

    def u(shape, fan_in):
        nonlocal ki
        k = 1.0 / jnp.sqrt(jnp.float32(fan_in))
        v = jax.random.uniform(keys[ki], shape, jnp.float32, -k, k)
        ki += 1
        return v

    params = {
        # emb_layer: Linear(D -> H); PyTorch weight is (H, D)
        "w_emb": u((H, D), D), "b_emb": u((H,), D),
        # LSTM layer 0: W_ih (4H, H), W_hh (4H, H), b_ih (4H,), b_hh (4H,)
        "w_ih0": u((4 * H, H), H), "w_hh0": u((4 * H, H), H),
        "b_ih0": u((4 * H,), H), "b_hh0": u((4 * H,), H),
        # LSTM layer 1
        "w_ih1": u((4 * H, H), H), "w_hh1": u((4 * H, H), H),
        "b_ih1": u((4 * H,), H), "b_hh1": u((4 * H,), H),
        # out_layer: Linear(H -> D); PyTorch weight is (D, H)
        "w_out": u((D, H), H), "b_out": u((D,), H),
    }
    return params


@jax.jit
def lstm_model_forward(input_data, params):
    """input_data: (B, T, D) float32. Returns (out, (h_n, c_n))."""
    B, T, D = input_data.shape
    H = params["w_emb"].shape[0]

    # Time-major flatten so rows [t*B:(t+1)*B] of the hoisted projection
    # correspond to timestep t.
    x_flat = jnp.transpose(input_data, (1, 0, 2)).reshape(T * B, D)

    # Fuse emb_layer into layer-0's input projection:
    #   e = x @ W_emb^T + b_emb ;  gates0_x = e @ W_ih0^T + b_ih0 + b_hh0
    #   => gates0_x = x @ (W_emb^T W_ih0^T) + (b_emb W_ih0^T + b_ih0 + b_hh0)
    w_emb_t = params["w_emb"].T                                    # (D, H)
    w_ih0_t = params["w_ih0"].T                                    # (H, 4H)
    w01 = w_emb_t @ w_ih0_t                                        # (D, 4H)
    b01 = (params["b_emb"] @ w_ih0_t
           + params["b_ih0"] + params["b_hh0"]).reshape(1, 4 * H)

    w_hh0 = params["w_hh0"].T                                      # (H, 4H)

    # Fuse layer-1's two matmuls: [h0_t ; h1] @ [W_ih1 ; W_hh1]
    w_cat1 = jnp.concatenate([params["w_ih1"].T, params["w_hh1"].T],
                             axis=0)                               # (2H, 4H)
    b1 = (params["b_ih1"] + params["b_hh1"]).reshape(1, 4 * H)

    w_out = params["w_out"].T                                      # (H, D)
    b_out = params["b_out"].reshape(1, D)

    out, state = pl.pallas_call(
        lstm_model_kernel,
        out_shape=(
            jax.ShapeDtypeStruct((B, D), jnp.float32),        # out_layer output
            jax.ShapeDtypeStruct((4 * B, H), jnp.float32),    # [h0; h1; c0; c1]
        ),
        in_specs=[pl.BlockSpec(memory_space=pltpu.VMEM)] * 8,
        out_specs=(pl.BlockSpec(memory_space=pltpu.VMEM),
                   pl.BlockSpec(memory_space=pltpu.VMEM)),
    )(x_flat, w01, b01, w_hh0, w_cat1, b1, w_out, b_out)

    h_n = state[:2 * B].reshape(2, B, H)
    c_n = state[2 * B:].reshape(2, B, H)
    # NOTE: PyTorch `.squeeze()` on (B, D) with B>1, D>1 is a no-op; return (B, D).
    return out, (h_n, c_n)


# --------------------------- pure-JAX reference ----------------------------- #

def lstm_model_reference(input_data, params):
    B, T, D = input_data.shape
    H = params["w_emb"].shape[0]

    def cell(xt, h, c, w_ih, w_hh, b_ih, b_hh):
        gates = xt @ w_ih.T + b_ih + h @ w_hh.T + b_hh
        i = jax.nn.sigmoid(gates[:, 0 * H:1 * H])
        f = jax.nn.sigmoid(gates[:, 1 * H:2 * H])
        g = jnp.tanh(gates[:, 2 * H:3 * H])
        o = jax.nn.sigmoid(gates[:, 3 * H:4 * H])
        c = f * c + i * g
        h = o * jnp.tanh(c)
        return h, c

    e = input_data @ params["w_emb"].T + params["b_emb"]          # (B, T, H)
    h0 = c0 = h1 = c1 = jnp.zeros((B, H), jnp.float32)
    for t in range(T):
        h0, c0 = cell(e[:, t, :], h0, c0, params["w_ih0"], params["w_hh0"],
                      params["b_ih0"], params["b_hh0"])
        h1, c1 = cell(h0, h1, c1, params["w_ih1"], params["w_hh1"],
                      params["b_ih1"], params["b_hh1"])
    out = h1 @ params["w_out"].T + params["b_out"]
    h_n = jnp.stack([h0, h1])
    c_n = jnp.stack([c0, c1])
    return out, (h_n, c_n)


# --------------------------------- main ------------------------------------ #

if __name__ == "__main__":
    B, T, D, H = 2, 8, 4, 32   # batch, seq, input_dim, rnn_unit

    key = jax.random.PRNGKey(0)
    k_x, k_p = jax.random.split(key)
    x = jax.random.normal(k_x, (B, T, D), jnp.float32)
    params = init_params(k_p, input_dim=D, rnn_unit=H)

    out, (h_n, c_n) = lstm_model_forward(x, params)
    jax.block_until_ready((out, h_n, c_n))

    ref_out, (ref_h, ref_c) = lstm_model_reference(x, params)
    assert jnp.allclose(out, ref_out, rtol=1e-4, atol=1e-4)
    assert jnp.allclose(h_n, ref_h, rtol=1e-4, atol=1e-4)
    assert jnp.allclose(c_n, ref_c, rtol=1e-4, atol=1e-4)

    print("KERNEL_OK")
</pallas_src>

<mosaic_0001>
module attributes {stable_mosaic.version = 11 : i64} {
  func.func @lstm_model_kernel(%arg0: memref<16x4xf32, #tpu.memory_space<vmem>>, %arg1: memref<4x128xf32, #tpu.memory_space<vmem>>, %arg2: memref<1x128xf32, #tpu.memory_space<vmem>>, %arg3: memref<32x128xf32, #tpu.memory_space<vmem>>, %arg4: memref<64x128xf32, #tpu.memory_space<vmem>>, %arg5: memref<1x128xf32, #tpu.memory_space<vmem>>, %arg6: memref<32x4xf32, #tpu.memory_space<vmem>>, %arg7: memref<1x4xf32, #tpu.memory_space<vmem>>, %arg8: memref<2x4xf32, #tpu.memory_space<vmem>>, %arg9: memref<8x32xf32, #tpu.memory_space<vmem>>) attributes {dimension_semantics = [], scalar_prefetch = 0 : i64, scratch_operands = 0 : i64, tpu.core_type = #tpu.core_type<tc>} {
    %c0 = arith.constant 0 : index
    %c0_0 = arith.constant 0 : index
    %0 = vector.load %arg0[%c0, %c0_0] : memref<16x4xf32, #tpu.memory_space<vmem>>, vector<16x4xf32>
    %c0_1 = arith.constant 0 : index
    %c0_2 = arith.constant 0 : index
    %1 = vector.load %arg1[%c0_1, %c0_2] : memref<4x128xf32, #tpu.memory_space<vmem>>, vector<4x128xf32>
    %cst = arith.constant dense<0.000000e+00> : vector<16x128xf32>
    %2 = tpu.matmul %0, %1, %cst {dimension_numbers = #tpu.dot_dimension_numbers<[1], [0], [0], [1], [0, 0, 1, 1], [], []>} : vector<16x4xf32>, vector<4x128xf32>, vector<16x128xf32> -> vector<16x128xf32>
    %c0_3 = arith.constant 0 : index
    %c0_4 = arith.constant 0 : index
    %3 = vector.load %arg2[%c0_3, %c0_4] : memref<1x128xf32, #tpu.memory_space<vmem>>, vector<1x128xf32>
    %4 = vector.broadcast %3 : vector<1x128xf32> to vector<16x128xf32>
    %5 = arith.addf %2, %4 : vector<16x128xf32>
    %c0_5 = arith.constant 0 : index
    %c0_6 = arith.constant 0 : index
    %6 = vector.load %arg3[%c0_5, %c0_6] : memref<32x128xf32, #tpu.memory_space<vmem>>, vector<32x128xf32>
    %c0_7 = arith.constant 0 : index
    %c0_8 = arith.constant 0 : index
    %7 = vector.load %arg4[%c0_7, %c0_8] : memref<64x128xf32, #tpu.memory_space<vmem>>, vector<64x128xf32>
    %c0_9 = arith.constant 0 : index
    %c0_10 = arith.constant 0 : index
    %8 = vector.load %arg5[%c0_9, %c0_10] : memref<1x128xf32, #tpu.memory_space<vmem>>, vector<1x128xf32>
    %9 = vector.shape_cast %8 : vector<1x128xf32> to vector<1x128xf32>
    %10 = vector.broadcast %9 : vector<1x128xf32> to vector<2x128xf32>
    %cst_11 = arith.constant 0.000000e+00 : f32
    %11 = vector.broadcast %cst_11 : f32 to vector<2x32xf32>
    %12 = vector.extract_strided_slice %5 {offsets = [0, 0], sizes = [2, 128], strides = [1, 1]} : vector<16x128xf32> to vector<2x128xf32>
    %cst_12 = arith.constant dense<0.000000e+00> : vector<2x128xf32>
    %13 = tpu.matmul %11, %6, %cst_12 {dimension_numbers = #tpu.dot_dimension_numbers<[1], [0], [0], [1], [0, 0, 1, 1], [], []>} : vector<2x32xf32>, vector<32x128xf32>, vector<2x128xf32> -> vector<2x128xf32>
    %14 = arith.addf %12, %13 : vector<2x128xf32>
    %15 = arith.negf %14 : vector<2x128xf32>
    %16 = math.exp %15 : vector<2x128xf32>
    %cst_13 = arith.constant 1.000000e+00 : f32
    %17 = vector.broadcast %cst_13 : f32 to vector<2x128xf32>
    %18 = arith.addf %17, %16 : vector<2x128xf32>
    %19 = arith.divf %17, %18 : vector<2x128xf32>
    %20 = math.tanh %14 : vector<2x128xf32>
    %21 = vector.extract_strided_slice %19 {offsets = [0, 0], sizes = [2, 32], strides = [1, 1]} : vector<2x128xf32> to vector<2x32xf32>
    %22 = vector.extract_strided_slice %19 {offsets = [0, 32], sizes = [2, 32], strides = [1, 1]} : vector<2x128xf32> to vector<2x32xf32>
    %23 = vector.extract_strided_slice %20 {offsets = [0, 64], sizes = [2, 32], strides = [1, 1]} : vector<2x128xf32> to vector<2x32xf32>
    %24 = vector.extract_strided_slice %19 {offsets = [0, 96], sizes = [2, 32], strides = [1, 1]} : vector<2x128xf32> to vector<2x32xf32>
    %25 = arith.mulf %22, %11 : vector<2x32xf32>
    %26 = arith.mulf %21, %23 : vector<2x32xf32>
    %27 = arith.addf %25, %26 : vector<2x32xf32>
    %28 = math.tanh %27 : vector<2x32xf32>
    %29 = arith.mulf %24, %28 : vector<2x32xf32>
    %30 = tpu.concatenate %29, %11 in 1 : vector<2x32xf32>, vector<2x32xf32> -> vector<2x64xf32>
    %cst_14 = arith.constant dense<0.000000e+00> : vector<2x128xf32>
    %31 = tpu.matmul %30, %7, %cst_14 {dimension_numbers = #tpu.dot_dimension_numbers<[1], [0], [0], [1], [0, 0, 1, 1], [], []>} : vector<2x64xf32>, vector<64x128xf32>, vector<2x128xf32> -> vector<2x128xf32>
    %32 = arith.addf %31, %10 : vector<2x128xf32>
    %33 = arith.negf %32 : vector<2x128xf32>
    %34 = math.exp %33 : vector<2x128xf32>
    %cst_15 = arith.constant 1.000000e+00 : f32
    %35 = vector.broadcast %cst_15 : f32 to vector<2x128xf32>
    %36 = arith.addf %35, %34 : vector<2x128xf32>
    %37 = arith.divf %35, %36 : vector<2x128xf32>
    %38 = math.tanh %32 : vector<2x128xf32>
    %39 = vector.extract_strided_slice %37 {offsets = [0, 0], sizes = [2, 32], strides = [1, 1]} : vector<2x128xf32> to vector<2x32xf32>
    %40 = vector.extract_strided_slice %37 {offsets = [0, 32], sizes = [2, 32], strides = [1, 1]} : vector<2x128xf32> to vector<2x32xf32>
    %41 = vector.extract_strided_slice %38 {offsets = [0, 64], sizes = [2, 32], strides = [1, 1]} : vector<2x128xf32> to vector<2x32xf32>
    %42 = vector.extract_strided_slice %37 {offsets = [0, 96], sizes = [2, 32], strides = [1, 1]} : vector<2x128xf32> to vector<2x32xf32>
    %43 = arith.mulf %40, %11 : vector<2x32xf32>
    %44 = arith.mulf %39, %41 : vector<2x32xf32>
    %45 = arith.addf %43, %44 : vector<2x32xf32>
    %46 = math.tanh %45 : vector<2x32xf32>
    %47 = arith.mulf %42, %46 : vector<2x32xf32>
    %48 = vector.extract_strided_slice %5 {offsets = [2, 0], sizes = [2, 128], strides = [1, 1]} : vector<16x128xf32> to vector<2x128xf32>
    %cst_16 = arith.constant dense<0.000000e+00> : vector<2x128xf32>
    %49 = tpu.matmul %29, %6, %cst_16 {dimension_numbers = #tpu.dot_dimension_numbers<[1], [0], [0], [1], [0, 0, 1, 1], [], []>} : vector<2x32xf32>, vector<32x128xf32>, vector<2x128xf32> -> vector<2x128xf32>
    %50 = arith.addf %48, %49 : vector<2x128xf32>
    %51 = arith.negf %50 : vector<2x128xf32>
    %52 = math.exp %51 : vector<2x128xf32>
    %cst_17 = arith.constant 1.000000e+00 : f32
    %53 = vector.broadcast %cst_17 : f32 to vector<2x128xf32>
    %54 = arith.addf %53, %52 : vector<2x128xf32>
    %55 = arith.divf %53, %54 : vector<2x128xf32>
    %56 = math.tanh %50 : vector<2x128xf32>
    %57 = vector.extract_strided_slice %55 {offsets = [0, 0], sizes = [2, 32], strides = [1, 1]} : vector<2x128xf32> to vector<2x32xf32>
    %58 = vector.extract_strided_slice %55 {offsets = [0, 32], sizes = [2, 32], strides = [1, 1]} : vector<2x128xf32> to vector<2x32xf32>
    %59 = vector.extract_strided_slice %56 {offsets = [0, 64], sizes = [2, 32], strides = [1, 1]} : vector<2x128xf32> to vector<2x32xf32>
    %60 = vector.extract_strided_slice %55 {offsets = [0, 96], sizes = [2, 32], strides = [1, 1]} : vector<2x128xf32> to vector<2x32xf32>
    %61 = arith.mulf %58, %27 : vector<2x32xf32>
    %62 = arith.mulf %57, %59 : vector<2x32xf32>
    %63 = arith.addf %61, %62 : vector<2x32xf32>
    %64 = math.tanh %63 : vector<2x32xf32>
    %65 = arith.mulf %60, %64 : vector<2x32xf32>
    %66 = tpu.concatenate %65, %47 in 1 : vector<2x32xf32>, vector<2x32xf32> -> vector<2x64xf32>
    %cst_18 = arith.constant dense<0.000000e+00> : vector<2x128xf32>
    %67 = tpu.matmul %66, %7, %cst_18 {dimension_numbers = #tpu.dot_dimension_numbers<[1], [0], [0], [1], [0, 0, 1, 1], [], []>} : vector<2x64xf32>, vector<64x128xf32>, vector<2x128xf32> -> vector<2x128xf32>
    %68 = arith.addf %67, %10 : vector<2x128xf32>
    %69 = arith.negf %68 : vector<2x128xf32>
    %70 = math.exp %69 : vector<2x128xf32>
    %cst_19 = arith.constant 1.000000e+00 : f32
    %71 = vector.broadcast %cst_19 : f32 to vector<2x128xf32>
    %72 = arith.addf %71, %70 : vector<2x128xf32>
    %73 = arith.divf %71, %72 : vector<2x128xf32>
    %74 = math.tanh %68 : vector<2x128xf32>
    %75 = vector.extract_strided_slice %73 {offsets = [0, 0], sizes = [2, 32], strides = [1, 1]} : vector<2x128xf32> to vector<2x32xf32>
    %76 = vector.extract_strided_slice %73 {offsets = [0, 32], sizes = [2, 32], strides = [1, 1]} : vector<2x128xf32> to vector<2x32xf32>
    %77 = vector.extract_strided_slice %74 {offsets = [0, 64], sizes = [2, 32], strides = [1, 1]} : vector<2x128xf32> to vector<2x32xf32>
    %78 = vector.extract_strided_slice %73 {offsets = [0, 96], sizes = [2, 32], strides = [1, 1]} : vector<2x128xf32> to vector<2x32xf32>
    %79 = arith.mulf %76, %45 : vector<2x32xf32>
    %80 = arith.mulf %75, %77 : vector<2x32xf32>
    %81 = arith.addf %79, %80 : vector<2x32xf32>
    %82 = math.tanh %81 : vector<2x32xf32>
    %83 = arith.mulf %78, %82 : vector<2x32xf32>
    %84 = vector.extract_strided_slice %5 {offsets = [4, 0], sizes = [2, 128], strides = [1, 1]} : vector<16x128xf32> to vector<2x128xf32>
    %cst_20 = arith.constant dense<0.000000e+00> : vector<2x128xf32>
    %85 = tpu.matmul %65, %6, %cst_20 {dimension_numbers = #tpu.dot_dimension_numbers<[1], [0], [0], [1], [0, 0, 1, 1], [], []>} : vector<2x32xf32>, vector<32x128xf32>, vector<2x128xf32> -> vector<2x128xf32>
    %86 = arith.addf %84, %85 : vector<2x128xf32>
    %87 = arith.negf %86 : vector<2x128xf32>
    %88 = math.exp %87 : vector<2x128xf32>
    %cst_21 = arith.constant 1.000000e+00 : f32
    %89 = vector.broadcast %cst_21 : f32 to vector<2x128xf32>
    %90 = arith.addf %89, %88 : vector<2x128xf32>
    %91 = arith.divf %89, %90 : vector<2x128xf32>
    %92 = math.tanh %86 : vector<2x128xf32>
    %93 = vector.extract_strided_slice %91 {offsets = [0, 0], sizes = [2, 32], strides = [1, 1]} : vector<2x128xf32> to vector<2x32xf32>
    %94 = vector.extract_strided_slice %91 {offsets = [0, 32], sizes = [2, 32], strides = [1, 1]} : vector<2x128xf32> to vector<2x32xf32>
    %95 = vector.extract_strided_slice %92 {offsets = [0, 64], sizes = [2, 32], strides = [1, 1]} : vector<2x128xf32> to vector<2x32xf32>
    %96 = vector.extract_strided_slice %91 {offsets = [0, 96], sizes = [2, 32], strides = [1, 1]} : vector<2x128xf32> to vector<2x32xf32>
    %97 = arith.mulf %94, %63 : vector<2x32xf32>
    %98 = arith.mulf %93, %95 : vector<2x32xf32>
    %99 = arith.addf %97, %98 : vector<2x32xf32>
    %100 = math.tanh %99 : vector<2x32xf32>
    %101 = arith.mulf %96, %100 : vector<2x32xf32>
    %102 = tpu.concatenate %101, %83 in 1 : vector<2x32xf32>, vector<2x32xf32> -> vector<2x64xf32>
    %cst_22 = arith.constant dense<0.000000e+00> : vector<2x128xf32>
    %103 = tpu.matmul %102, %7, %cst_22 {dimension_numbers = #tpu.dot_dimension_numbers<[1], [0], [0], [1], [0, 0, 1, 1], [], []>} : vector<2x64xf32>, vector<64x128xf32>, vector<2x128xf32> -> vector<2x128xf32>
    %104 = arith.addf %103, %10 : vector<2x128xf32>
    %105 = arith.negf %104 : vector<2x128xf32>
    %106 = math.exp %105 : vector<2x128xf32>
    %cst_23 = arith.constant 1.000000e+00 : f32
    %107 = vector.broadcast %cst_23 : f32 to vector<2x128xf32>
    %108 = arith.addf %107, %106 : vector<2x128xf32>
    %109 = arith.divf %107, %108 : vector<2x128xf32>
    %110 = math.tanh %104 : vector<2x128xf32>
    %111 = vector.extract_strided_slice %109 {offsets = [0, 0], sizes = [2, 32], strides = [1, 1]} : vector<2x128xf32> to vector<2x32xf32>
    %112 = vector.extract_strided_slice %109 {offsets = [0, 32], sizes = [2, 32], strides = [1, 1]} : vector<2x128xf32> to vector<2x32xf32>
    %113 = vector.extract_strided_slice %110 {offsets = [0, 64], sizes = [2, 32], strides = [1, 1]} : vector<2x128xf32> to vector<2x32xf32>
    %114 = vector.extract_strided_slice %109 {offsets = [0, 96], sizes = [2, 32], strides = [1, 1]} : vector<2x128xf32> to vector<2x32xf32>
    %115 = arith.mulf %112, %81 : vector<2x32xf32>
    %116 = arith.mulf %111, %113 : vector<2x32xf32>
    %117 = arith.addf %115, %116 : vector<2x32xf32>
    %118 = math.tanh %117 : vector<2x32xf32>
    %119 = arith.mulf %114, %118 : vector<2x32xf32>
    %120 = vector.extract_strided_slice %5 {offsets = [6, 0], sizes = [2, 128], strides = [1, 1]} : vector<16x128xf32> to vector<2x128xf32>
    %cst_24 = arith.constant dense<0.000000e+00> : vector<2x128xf32>
    %121 = tpu.matmul %101, %6, %cst_24 {dimension_numbers = #tpu.dot_dimension_numbers<[1], [0], [0], [1], [0, 0, 1, 1], [], []>} : vector<2x32xf32>, vector<32x128xf32>, vector<2x128xf32> -> vector<2x128xf32>
    %122 = arith.addf %120, %121 : vector<2x128xf32>
    %123 = arith.negf %122 : vector<2x128xf32>
    %124 = math.exp %123 : vector<2x128xf32>
    %cst_25 = arith.constant 1.000000e+00 : f32
    %125 = vector.broadcast %cst_25 : f32 to vector<2x128xf32>
    %126 = arith.addf %125, %124 : vector<2x128xf32>
    %127 = arith.divf %125, %126 : vector<2x128xf32>
    %128 = math.tanh %122 : vector<2x128xf32>
    %129 = vector.extract_strided_slice %127 {offsets = [0, 0], sizes = [2, 32], strides = [1, 1]} : vector<2x128xf32> to vector<2x32xf32>
    %130 = vector.extract_strided_slice %127 {offsets = [0, 32], sizes = [2, 32], strides = [1, 1]} : vector<2x128xf32> to vector<2x32xf32>
    %131 = vector.extract_strided_slice %128 {offsets = [0, 64], sizes = [2, 32], strides = [1, 1]} : vector<2x128xf32> to vector<2x32xf32>
    %132 = vector.extract_strided_slice %127 {offsets = [0, 96], sizes = [2, 32], strides = [1, 1]} : vector<2x128xf32> to vector<2x32xf32>
    %133 = arith.mulf %130, %99 : vector<2x32xf32>
    %134 = arith.mulf %129, %131 : vector<2x32xf32>
    %135 = arith.addf %133, %134 : vector<2x32xf32>
    %136 = math.tanh %135 : vector<2x32xf32>
    %137 = arith.mulf %132, %136 : vector<2x32xf32>
    %138 = tpu.concatenate %137, %119 in 1 : vector<2x32xf32>, vector<2x32xf32> -> vector<2x64xf32>
    %cst_26 = arith.constant dense<0.000000e+00> : vector<2x128xf32>
    %139 = tpu.matmul %138, %7, %cst_26 {dimension_numbers = #tpu.dot_dimension_numbers<[1], [0], [0], [1], [0, 0, 1, 1], [], []>} : vector<2x64xf32>, vector<64x128xf32>, vector<2x128xf32> -> vector<2x128xf32>
    %140 = arith.addf %139, %10 : vector<2x128xf32>
    %141 = arith.negf %140 : vector<2x128xf32>
    %142 = math.exp %141 : vector<2x128xf32>
    %cst_27 = arith.constant 1.000000e+00 : f32
    %143 = vector.broadcast %cst_27 : f32 to vector<2x128xf32>
    %144 = arith.addf %143, %142 : vector<2x128xf32>
    %145 = arith.divf %143, %144 : vector<2x128xf32>
    %146 = math.tanh %140 : vector<2x128xf32>
    %147 = vector.extract_strided_slice %145 {offsets = [0, 0], sizes = [2, 32], strides = [1, 1]} : vector<2x128xf32> to vector<2x32xf32>
    %148 = vector.extract_strided_slice %145 {offsets = [0, 32], sizes = [2, 32], strides = [1, 1]} : vector<2x128xf32> to vector<2x32xf32>
    %149 = vector.extract_strided_slice %146 {offsets = [0, 64], sizes = [2, 32], strides = [1, 1]} : vector<2x128xf32> to vector<2x32xf32>
    %150 = vector.extract_strided_slice %145 {offsets = [0, 96], sizes = [2, 32], strides = [1, 1]} : vector<2x128xf32> to vector<2x32xf32>
    %151 = arith.mulf %148, %117 : vector<2x32xf32>
    %152 = arith.mulf %147, %149 : vector<2x32xf32>
    %153 = arith.addf %151, %152 : vector<2x32xf32>
    %154 = math.tanh %153 : vector<2x32xf32>
    %155 = arith.mulf %150, %154 : vector<2x32xf32>
    %156 = vector.extract_strided_slice %5 {offsets = [8, 0], sizes = [2, 128], strides = [1, 1]} : vector<16x128xf32> to vector<2x128xf32>
    %cst_28 = arith.constant dense<0.000000e+00> : vector<2x128xf32>
    %157 = tpu.matmul %137, %6, %cst_28 {dimension_numbers = #tpu.dot_dimension_numbers<[1], [0], [0], [1], [0, 0, 1, 1], [], []>} : vector<2x32xf32>, vector<32x128xf32>, vector<2x128xf32> -> vector<2x128xf32>
    %158 = arith.addf %156, %157 : vector<2x128xf32>
    %159 = arith.negf %158 : vector<2x128xf32>
    %160 = math.exp %159 : vector<2x128xf32>
    %cst_29 = arith.constant 1.000000e+00 : f32
    %161 = vector.broadcast %cst_29 : f32 to vector<2x128xf32>
    %162 = arith.addf %161, %160 : vector<2x128xf32>
    %163 = arith.divf %161, %162 : vector<2x128xf32>
    %164 = math.tanh %158 : vector<2x128xf32>
    %165 = vector.extract_strided_slice %163 {offsets = [0, 0], sizes = [2, 32], strides = [1, 1]} : vector<2x128xf32> to vector<2x32xf32>
    %166 = vector.extract_strided_slice %163 {offsets = [0, 32], sizes = [2, 32], strides = [1, 1]} : vector<2x128xf32> to vector<2x32xf32>
    %167 = vector.extract_strided_slice %164 {offsets = [0, 64], sizes = [2, 32], strides = [1, 1]} : vector<2x128xf32> to vector<2x32xf32>
    %168 = vector.extract_strided_slice %163 {offsets = [0, 96], sizes = [2, 32], strides = [1, 1]} : vector<2x128xf32> to vector<2x32xf32>
    %169 = arith.mulf %166, %135 : vector<2x32xf32>
    %170 = arith.mulf %165, %167 : vector<2x32xf32>
    %171 = arith.addf %169, %170 : vector<2x32xf32>
    %172 = math.tanh %171 : vector<2x32xf32>
    %173 = arith.mulf %168, %172 : vector<2x32xf32>
    %174 = tpu.concatenate %173, %155 in 1 : vector<2x32xf32>, vector<2x32xf32> -> vector<2x64xf32>
    %cst_30 = arith.constant dense<0.000000e+00> : vector<2x128xf32>
    %175 = tpu.matmul %174, %7, %cst_30 {dimension_numbers = #tpu.dot_dimension_numbers<[1], [0], [0], [1], [0, 0, 1, 1], [], []>} : vector<2x64xf32>, vector<64x128xf32>, vector<2x128xf32> -> vector<2x128xf32>
    %176 = arith.addf %175, %10 : vector<2x128xf32>
    %177 = arith.negf %176 : vector<2x128xf32>
    %178 = math.exp %177 : vector<2x128xf32>
    %cst_31 = arith.constant 1.000000e+00 : f32
    %179 = vector.broadcast %cst_31 : f32 to vector<2x128xf32>
    %180 = arith.addf %179, %178 : vector<2x128xf32>
    %181 = arith.divf %179, %180 : vector<2x128xf32>
    %182 = math.tanh %176 : vector<2x128xf32>
    %183 = vector.extract_strided_slice %181 {offsets = [0, 0], sizes = [2, 32], strides = [1, 1]} : vector<2x128xf32> to vector<2x32xf32>
    %184 = vector.extract_strided_slice %181 {offsets = [0, 32], sizes = [2, 32], strides = [1, 1]} : vector<2x128xf32> to vector<2x32xf32>
    %185 = vector.extract_strided_slice %182 {offsets = [0, 64], sizes = [2, 32], strides = [1, 1]} : vector<2x128xf32> to vector<2x32xf32>
    %186 = vector.extract_strided_slice %181 {offsets = [0, 96], sizes = [2, 32], strides = [1, 1]} : vector<2x128xf32> to vector<2x32xf32>
    %187 = arith.mulf %184, %153 : vector<2x32xf32>
    %188 = arith.mulf %183, %185 : vector<2x32xf32>
    %189 = arith.addf %187, %188 : vector<2x32xf32>
    %190 = math.tanh %189 : vector<2x32xf32>
    %191 = arith.mulf %186, %190 : vector<2x32xf32>
    %192 = vector.extract_strided_slice %5 {offsets = [10, 0], sizes = [2, 128], strides = [1, 1]} : vector<16x128xf32> to vector<2x128xf32>
    %cst_32 = arith.constant dense<0.000000e+00> : vector<2x128xf32>
    %193 = tpu.matmul %173, %6, %cst_32 {dimension_numbers = #tpu.dot_dimension_numbers<[1], [0], [0], [1], [0, 0, 1, 1], [], []>} : vector<2x32xf32>, vector<32x128xf32>, vector<2x128xf32> -> vector<2x128xf32>
    %194 = arith.addf %192, %193 : vector<2x128xf32>
    %195 = arith.negf %194 : vector<2x128xf32>
    %196 = math.exp %195 : vector<2x128xf32>
    %cst_33 = arith.constant 1.000000e+00 : f32
    %197 = vector.broadcast %cst_33 : f32 to vector<2x128xf32>
    %198 = arith.addf %197, %196 : vector<2x128xf32>
    %199 = arith.divf %197, %198 : vector<2x128xf32>
    %200 = math.tanh %194 : vector<2x128xf32>
    %201 = vector.extract_strided_slice %199 {offsets = [0, 0], sizes = [2, 32], strides = [1, 1]} : vector<2x128xf32> to vector<2x32xf32>
    %202 = vector.extract_strided_slice %199 {offsets = [0, 32], sizes = [2, 32], strides = [1, 1]} : vector<2x128xf32> to vector<2x32xf32>
    %203 = vector.extract_strided_slice %200 {offsets = [0, 64], sizes = [2, 32], strides = [1, 1]} : vector<2x128xf32> to vector<2x32xf32>
    %204 = vector.extract_strided_slice %199 {offsets = [0, 96], sizes = [2, 32], strides = [1, 1]} : vector<2x128xf32> to vector<2x32xf32>
    %205 = arith.mulf %202, %171 : vector<2x32xf32>
    %206 = arith.mulf %201, %203 : vector<2x32xf32>
    %207 = arith.addf %205, %206 : vector<2x32xf32>
    %208 = math.tanh %207 : vector<2x32xf32>
    %209 = arith.mulf %204, %208 : vector<2x32xf32>
    %210 = tpu.concatenate %209, %191 in 1 : vector<2x32xf32>, vector<2x32xf32> -> vector<2x64xf32>
    %cst_34 = arith.constant dense<0.000000e+00> : vector<2x128xf32>
    %211 = tpu.matmul %210, %7, %cst_34 {dimension_numbers = #tpu.dot_dimension_numbers<[1], [0], [0], [1], [0, 0, 1, 1], [], []>} : vector<2x64xf32>, vector<64x128xf32>, vector<2x128xf32> -> vector<2x128xf32>
    %212 = arith.addf %211, %10 : vector<2x128xf32>
    %213 = arith.negf %212 : vector<2x128xf32>
    %214 = math.exp %213 : vector<2x128xf32>
    %cst_35 = arith.constant 1.000000e+00 : f32
    %215 = vector.broadcast %cst_35 : f32 to vector<2x128xf32>
    %216 = arith.addf %215, %214 : vector<2x128xf32>
    %217 = arith.divf %215, %216 : vector<2x128xf32>
    %218 = math.tanh %212 : vector<2x128xf32>
    %219 = vector.extract_strided_slice %217 {offsets = [0, 0], sizes = [2, 32], strides = [1, 1]} : vector<2x128xf32> to vector<2x32xf32>
    %220 = vector.extract_strided_slice %217 {offsets = [0, 32], sizes = [2, 32], strides = [1, 1]} : vector<2x128xf32> to vector<2x32xf32>
    %221 = vector.extract_strided_slice %218 {offsets = [0, 64], sizes = [2, 32], strides = [1, 1]} : vector<2x128xf32> to vector<2x32xf32>
    %222 = vector.extract_strided_slice %217 {offsets = [0, 96], sizes = [2, 32], strides = [1, 1]} : vector<2x128xf32> to vector<2x32xf32>
    %223 = arith.mulf %220, %189 : vector<2x32xf32>
    %224 = arith.mulf %219, %221 : vector<2x32xf32>
    %225 = arith.addf %223, %224 : vector<2x32xf32>
    %226 = math.tanh %225 : vector<2x32xf32>
    %227 = arith.mulf %222, %226 : vector<2x32xf32>
    %228 = vector.extract_strided_slice %5 {offsets = [12, 0], sizes = [2, 128], strides = [1, 1]} : vector<16x128xf32> to vector<2x128xf32>
    %cst_36 = arith.constant dense<0.000000e+00> : vector<2x128xf32>
    %229 = tpu.matmul %209, %6, %cst_36 {dimension_numbers = #tpu.dot_dimension_numbers<[1], [0], [0], [1], [0, 0, 1, 1], [], []>} : vector<2x32xf32>, vector<32x128xf32>, vector<2x128xf32> -> vector<2x128xf32>
    %230 = arith.addf %228, %229 : vector<2x128xf32>
    %231 = arith.negf %230 : vector<2x128xf32>
    %232 = math.exp %231 : vector<2x128xf32>
    %cst_37 = arith.constant 1.000000e+00 : f32
    %233 = vector.broadcast %cst_37 : f32 to vector<2x128xf32>
    %234 = arith.addf %233, %232 : vector<2x128xf32>
    %235 = arith.divf %233, %234 : vector<2x128xf32>
    %236 = math.tanh %230 : vector<2x128xf32>
    %237 = vector.extract_strided_slice %235 {offsets = [0, 0], sizes = [2, 32], strides = [1, 1]} : vector<2x128xf32> to vector<2x32xf32>
    %238 = vector.extract_strided_slice %235 {offsets = [0, 32], sizes = [2, 32], strides = [1, 1]} : vector<2x128xf32> to vector<2x32xf32>
    %239 = vector.extract_strided_slice %236 {offsets = [0, 64], sizes = [2, 32], strides = [1, 1]} : vector<2x128xf32> to vector<2x32xf32>
    %240 = vector.extract_strided_slice %235 {offsets = [0, 96], sizes = [2, 32], strides = [1, 1]} : vector<2x128xf32> to vector<2x32xf32>
    %241 = arith.mulf %238, %207 : vector<2x32xf32>
    %242 = arith.mulf %237, %239 : vector<2x32xf32>
    %243 = arith.addf %241, %242 : vector<2x32xf32>
    %244 = math.tanh %243 : vector<2x32xf32>
    %245 = arith.mulf %240, %244 : vector<2x32xf32>
    %246 = tpu.concatenate %245, %227 in 1 : vector<2x32xf32>, vector<2x32xf32> -> vector<2x64xf32>
    %cst_38 = arith.constant dense<0.000000e+00> : vector<2x128xf32>
    %247 = tpu.matmul %246, %7, %cst_38 {dimension_numbers = #tpu.dot_dimension_numbers<[1], [0], [0], [1], [0, 0, 1, 1], [], []>} : vector<2x64xf32>, vector<64x128xf32>, vector<2x128xf32> -> vector<2x128xf32>
    %248 = arith.addf %247, %10 : vector<2x128xf32>
    %249 = arith.negf %248 : vector<2x128xf32>
    %250 = math.exp %249 : vector<2x128xf32>
    %cst_39 = arith.constant 1.000000e+00 : f32
    %251 = vector.broadcast %cst_39 : f32 to vector<2x128xf32>
    %252 = arith.addf %251, %250 : vector<2x128xf32>
    %253 = arith.divf %251, %252 : vector<2x128xf32>
    %254 = math.tanh %248 : vector<2x128xf32>
    %255 = vector.extract_strided_slice %253 {offsets = [0, 0], sizes = [2, 32], strides = [1, 1]} : vector<2x128xf32> to vector<2x32xf32>
    %256 = vector.extract_strided_slice %253 {offsets = [0, 32], sizes = [2, 32], strides = [1, 1]} : vector<2x128xf32> to vector<2x32xf32>
    %257 = vector.extract_strided_slice %254 {offsets = [0, 64], sizes = [2, 32], strides = [1, 1]} : vector<2x128xf32> to vector<2x32xf32>
    %258 = vector.extract_strided_slice %253 {offsets = [0, 96], sizes = [2, 32], strides = [1, 1]} : vector<2x128xf32> to vector<2x32xf32>
    %259 = arith.mulf %256, %225 : vector<2x32xf32>
    %260 = arith.mulf %255, %257 : vector<2x32xf32>
    %261 = arith.addf %259, %260 : vector<2x32xf32>
    %262 = math.tanh %261 : vector<2x32xf32>
    %263 = arith.mulf %258, %262 : vector<2x32xf32>
    %264 = vector.extract_strided_slice %5 {offsets = [14, 0], sizes = [2, 128], strides = [1, 1]} : vector<16x128xf32> to vector<2x128xf32>
    %cst_40 = arith.constant dense<0.000000e+00> : vector<2x128xf32>
    %265 = tpu.matmul %245, %6, %cst_40 {dimension_numbers = #tpu.dot_dimension_numbers<[1], [0], [0], [1], [0, 0, 1, 1], [], []>} : vector<2x32xf32>, vector<32x128xf32>, vector<2x128xf32> -> vector<2x128xf32>
    %266 = arith.addf %264, %265 : vector<2x128xf32>
    %267 = arith.negf %266 : vector<2x128xf32>
    %268 = math.exp %267 : vector<2x128xf32>
    %cst_41 = arith.constant 1.000000e+00 : f32
    %269 = vector.broadcast %cst_41 : f32 to vector<2x128xf32>
    %270 = arith.addf %269, %268 : vector<2x128xf32>
    %271 = arith.divf %269, %270 : vector<2x128xf32>
    %272 = math.tanh %266 : vector<2x128xf32>
    %273 = vector.extract_strided_slice %271 {offsets = [0, 0], sizes = [2, 32], strides = [1, 1]} : vector<2x128xf32> to vector<2x32xf32>
    %274 = vector.extract_strided_slice %271 {offsets = [0, 32], sizes = [2, 32], strides = [1, 1]} : vector<2x128xf32> to vector<2x32xf32>
    %275 = vector.extract_strided_slice %272 {offsets = [0, 64], sizes = [2, 32], strides = [1, 1]} : vector<2x128xf32> to vector<2x32xf32>
    %276 = vector.extract_strided_slice %271 {offsets = [0, 96], sizes = [2, 32], strides = [1, 1]} : vector<2x128xf32> to vector<2x32xf32>
    %277 = arith.mulf %274, %243 : vector<2x32xf32>
    %278 = arith.mulf %273, %275 : vector<2x32xf32>
    %279 = arith.addf %277, %278 : vector<2x32xf32>
    %280 = math.tanh %279 : vector<2x32xf32>
    %281 = arith.mulf %276, %280 : vector<2x32xf32>
    %282 = tpu.concatenate %281, %263 in 1 : vector<2x32xf32>, vector<2x32xf32> -> vector<2x64xf32>
    %cst_42 = arith.constant dense<0.000000e+00> : vector<2x128xf32>
    %283 = tpu.matmul %282, %7, %cst_42 {dimension_numbers = #tpu.dot_dimension_numbers<[1], [0], [0], [1], [0, 0, 1, 1], [], []>} : vector<2x64xf32>, vector<64x128xf32>, vector<2x128xf32> -> vector<2x128xf32>
    %284 = arith.addf %283, %10 : vector<2x128xf32>
    %285 = arith.negf %284 : vector<2x128xf32>
    %286 = math.exp %285 : vector<2x128xf32>
    %cst_43 = arith.constant 1.000000e+00 : f32
    %287 = vector.broadcast %cst_43 : f32 to vector<2x128xf32>
    %288 = arith.addf %287, %286 : vector<2x128xf32>
    %289 = arith.divf %287, %288 : vector<2x128xf32>
    %290 = math.tanh %284 : vector<2x128xf32>
    %291 = vector.extract_strided_slice %289 {offsets = [0, 0], sizes = [2, 32], strides = [1, 1]} : vector<2x128xf32> to vector<2x32xf32>
    %292 = vector.extract_strided_slice %289 {offsets = [0, 32], sizes = [2, 32], strides = [1, 1]} : vector<2x128xf32> to vector<2x32xf32>
    %293 = vector.extract_strided_slice %290 {offsets = [0, 64], sizes = [2, 32], strides = [1, 1]} : vector<2x128xf32> to vector<2x32xf32>
    %294 = vector.extract_strided_slice %289 {offsets = [0, 96], sizes = [2, 32], strides = [1, 1]} : vector<2x128xf32> to vector<2x32xf32>
    %295 = arith.mulf %292, %261 : vector<2x32xf32>
    %296 = arith.mulf %291, %293 : vector<2x32xf32>
    %297 = arith.addf %295, %296 : vector<2x32xf32>
    %298 = math.tanh %297 : vector<2x32xf32>
    %299 = arith.mulf %294, %298 : vector<2x32xf32>
    %c0_44 = arith.constant 0 : index
    %c0_45 = arith.constant 0 : index
    %300 = vector.load %arg6[%c0_44, %c0_45] : memref<32x4xf32, #tpu.memory_space<vmem>>, vector<32x4xf32>
    %cst_46 = arith.constant dense<0.000000e+00> : vector<2x4xf32>
    %301 = tpu.matmul %299, %300, %cst_46 {dimension_numbers = #tpu.dot_dimension_numbers<[1], [0], [0], [1], [0, 0, 1, 1], [], []>} : vector<2x32xf32>, vector<32x4xf32>, vector<2x4xf32> -> vector<2x4xf32>
    %c0_47 = arith.constant 0 : index
    %c0_48 = arith.constant 0 : index
    %302 = vector.load %arg7[%c0_47, %c0_48] : memref<1x4xf32, #tpu.memory_space<vmem>>, vector<1x4xf32>
    %303 = vector.broadcast %302 : vector<1x4xf32> to vector<2x4xf32>
    %304 = arith.addf %301, %303 : vector<2x4xf32>
    %c0_49 = arith.constant 0 : index
    %c0_50 = arith.constant 0 : index
    %305 = vector.load %arg8[%c0_49, %c0_50] : memref<2x4xf32, #tpu.memory_space<vmem>>, vector<2x4xf32>
    tpu.vector_store %arg8[%c0_49, %c0_50], %304 {strides = array<i32>} : memref<2x4xf32, #tpu.memory_space<vmem>>, vector<2x4xf32>,
    %306 = tpu.concatenate %281, %299, %279, %297 in 0 : vector<2x32xf32>, vector<2x32xf32>, vector<2x32xf32>, vector<2x32xf32> -> vector<8x32xf32>
    %c0_51 = arith.constant 0 : index
    %c0_52 = arith.constant 0 : index
    %307 = vector.load %arg9[%c0_51, %c0_52] : memref<8x32xf32, #tpu.memory_space<vmem>>, vector<8x32xf32>
    tpu.vector_store %arg9[%c0_51, %c0_52], %306 {strides = array<i32>} : memref<8x32xf32, #tpu.memory_space<vmem>>, vector<8x32xf32>,
    return
  }
}

</mosaic_0001>

<bundles_post_ra>
// kernel: lstm_model_forward.1
= control target key start
LH: loop header
LB: loop body
LE: loop exit
PB: predicated region body
PF: predicated region fallthrough
CT: control target
= control target key end

     0   :  { %vm49_vm0 = vcmask 1043456   ;;  %v2688_v3 = vmov 0.0|0.0   ;;  %vm42_vm1 = vcmask 31744   ;;  %s3144_s0 = inlined_call_operand.vmem [shape: f32[16,4], index: 0, kind: input, shape index: {}]   ;;  %s3145_s1 = inlined_call_operand.vmem [shape: f32[4,128], index: 1, kind: input, shape index: {}]   ;;  %s3146_s2 = inlined_call_operand.vmem [shape: f32[1,128], index: 2, kind: input, shape index: {}]   ;;  %s3147_s3 = inlined_call_operand.vmem [shape: f32[32,128], index: 3, kind: input, shape index: {}]   ;;  %s3148_s4 = inlined_call_operand.vmem [shape: f32[64,128], index: 4, kind: input, shape index: {}]   ;;  %s3149_s5 = inlined_call_operand.vmem [shape: f32[1,128], index: 5, kind: input, shape index: {}]   ;;  %s3150_s6 = inlined_call_operand.vmem [shape: f32[32,4], index: 6, kind: input, shape index: {}]   ;;  %s3151_s7 = inlined_call_operand.vmem [shape: f32[1,4], index: 7, kind: input, shape index: {}]   ;;  %s3152_s8 = inlined_call_operand.hbm [shape: f32[2,4], index: 8, kind: output, shape index: {0}]   ;;  %s3153_s9 = inlined_call_operand.vmem [shape: f32[8,32], index: 9, kind: output, shape index: {1}]  }
   0x1   :  { %v128_v0 = vld [vmem:[%s3147_s3] sm:$0xff]  ;;  %v129_v1 = vld [vmem:[%s3147_s3 + $0x8] sm:$0xff]  ;;  %2380 = vmatprep.subr.bf16.mxu1 %v2688_v3  ;;  %v130_v7 = vld [vmem:[%s3147_s3 + $0x10] sm:$0xff] }
   0x2   :  { %v34_v2 = vld [vmem:[%s3145_s1] sm:$0xf]  ;;  %v2754_v4 = vpack.c.bf16 %v129_v1, %v128_v0  ;;  %v33_v6 = vld [vmem:[%s3144_s0 + $0x8] sm:$0xff]  ;;  %v131_v8 = vld [vmem:[%s3147_s3 + $0x18] sm:$0xff] }
   0x3   :  { %2124 = vmatprep.subr.msk.mxu0 %vm49_vm0, %v34_v2  ;;  %v32_v5 = vld [vmem:[%s3144_s0] sm:$0xff] }
   0x4   :  { %2125 = vmatpush3.msk.msra.mxu0 %vm49_vm0, %v34_v2  ;;  %2126 = vmatprep.mubr.msk.f32.mxu0 %vm42_vm1, %v32_v5 }
   0x5   :  { %15 = vsyncpa [#allocation3], 0  ;;  %2382 = vmatpush3.bf16.msra.mxu1 %v2754_v4  ;;  %2127 = vmatmul.mubr.msk.f32.vlgmr.msra.gmra.mrb[0].mxu0 %vm42_vm1, %v33_v6  ;;  %v2771_v9 = vpack.c.bf16 %v131_v8, %v130_v7  ;;  %vm2689_vm2 = vmmov 0   ;;  %v2690_v10 = vmov 0.0   ;;  %v1966_v11 = vld [vmem:[%s3146_s2] ss:$0 sm:$0xff] }
   0x6   :  { %2383 = vmatprep.subr.bf16.mxu1 %v2688_v3  ;;  %2137 = vmatprep.mubr.msk.f32.mxu1 %vm2689_vm2, %v2690_v10  ;;  %s2691_s22 = smov 64   ;;  %s2692_s2 = smov 32   ;;  %v132_v29 = vld [vmem:[%s3148_s4] sm:$0xff]  ;;  %v133_v30 = vld [vmem:[%s3148_s4 + $0x8] sm:$0xff]  ;;  %v134_v31 = vld [vmem:[%s3148_s4 + $0x10] sm:$0xff]  ;;  %vm147_vm3 = vcmask 261120  }
   0x7   :  { %2386 = vmatprep.subr.bf16.mxu0 %v2688_v3  ;;  %2156 = vmatprep.mubr.msk.f32.mxu0 %vm2689_vm2, %v2690_v10  ;;  %v2810_v32 = vpack.c.bf16 %v133_v30, %v132_v29  ;;  %v135_v33 = vld [vmem:[%s3148_s4 + $0x18] sm:$0xff]  ;;  %v136_v35 = vld [vmem:[%s3148_s4 + $0x20] sm:$0xff]  ;;  %v137_v36 = vld [vmem:[%s3148_s4 + $0x28] sm:$0xff]  ;;  %vm251_vm4 = vcmask 523264   ;;  %vm1938_vm5 = vcmask 1041408   ;;  %vm1941_vm6 = vcmask 1045504  }
   0x8   :  { %v2816_v34 = vpack.c.bf16 %v135_v33, %v134_v31  ;;  %v2826_v37 = vpack.c.bf16 %v137_v36, %v136_v35  ;;  %v138_v38 = vld [vmem:[%s3148_s4 + $0x30] sm:$0xff]  ;;  %v139_v39 = vld [vmem:[%s3148_s4 + $0x38] sm:$0xff]  ;;  %v2865_v46 = vld [vmem:[%s3149_s5] ss:$0 sm:$0xff]  ;;  %vm1922_vm7 = vcmask 25600  }
   0x9   :  { %2385 = vmatpush3.bf16.msra.mxu1 %v2771_v9  ;;  %2388 = vmatpush3.bf16.msra.mxu0 %v2810_v32  ;;  %v2837_v41 = vpack.c.bf16 %v139_v39, %v138_v38 }
   0xa   :  { %2398 = vmatprep.subr.bf16.mxu1 %v2688_v3  ;;  %2389 = vmatprep.subr.bf16.mxu0 %v2688_v3 }
   0xc   :  { %2138 = vmatmul.mubr.f32.vlgmr.msra.gmra.mrb[0].mxu1 %v2690_v10 }
   0xd   :  { %2400 = vmatpush3.bf16.msra.mxu1 %v2754_v4  ;;  %2167 = vmatprep.mubr.msk.f32.mxu1 %vm2689_vm2, %v2690_v10 }
   0xe   :  { %2401 = vmatprep.subr.bf16.mxu1 %v2688_v3  ;;  %2391 = vmatpush3.bf16.msra.mxu0 %v2816_v34 }
   0xf   :  { %2392 = vmatprep.subr.bf16.mxu0 %v2688_v3 }
  0x11   :  { %2403 = vmatpush3.bf16.msra.mxu1 %v2771_v9 }
  0x12   :  { %2404 = vmatprep.subr.bf16.mxu1 %v2688_v3  ;;  %2394 = vmatpush3.bf16.msra.mxu0 %v2826_v37 }
  0x13   :  { %2395 = vmatprep.subr.bf16.mxu0 %v2688_v3 }
  0x16   :  { %2397 = vmatpush3.bf16.msra.mxu0 %v2837_v41 }
  0x17   :  { %2416 = vmatprep.subr.bf16.mxu0 %v2688_v3 }
  0xd8   :  { %v2128_v12 = vpop.f32.mrb[0].mxu0 }
  0xd9   :  { %v2791_v13 = vadd.f32 %v2128_v12, %v1966_v11  ;;  %v119_v14 = vpop.f32.mrb[1].mxu0 }
  0xda   :  { %v2793_v15 = vadd.f32 %v1966_v11, %v119_v14 }
  0xdf   :  { %v217_v16 = vpop.f32.mrb[0].mxu1 }
  0xe0   :  { %v221_v17 = vadd.f32 %v217_v16, %v2793_v15  ;;  %v2139_v18 = vpop.f32.mrb[1].mxu1 }
  0xe2   :  { %2536 = vtanh.f32 %v221_v17  ;;  %v1971_v20 = vmul.f32 -1.442695, %v221_v17 }
  0xe4   :  { %2538 = vpow2.f32 %v1971_v20 }
  0xec   :  { %v2537_v19 = vpop.eup %2536 }
  0xed   :  { %231 = vrot.lane.b32.xlu0 %v2537_v19, %s2691_s22 }
  0xee   :  { %v2539_v21 = vpop.eup %2538 }
  0xef   :  { %v225_v22 = vadd.f32 1.0, %v2539_v21 }
  0xf1   :  { %2540 = vrcp.f32 %v225_v22 }
  0xfb   :  { %v2541_v23 = vpop.eup %2540 }
  0xfc   :  { %v229_v26 = vmul.f32 0.0, %v2541_v23 }
 0x15f   :  { %v232_v24 = vpop.permute.xlu0 %231 }
 0x160   :  { %v234_v25 = vmul.f32 %v2541_v23, %v232_v24 }
 0x162   :  { %236 = vrot.lane.b32.xlu0 %v234_v25, %s2692_s2 }
 0x1d4   :  { %v237_v27 = vpop.permute.xlu0 %236 }
 0x1d5   :  { %v2798_v28 = vadd.f32 %v237_v27, %v229_v26 }
 0x1d7   :  { %2542 = vtanh.f32 %v2798_v28  ;;  %v433_v6 = vrot.slane %v2798_v28, 6 }
 0x1e1   :  { %v2543_v40 = vpop.eup %2542 }
 0x1e2   :  { %242 = vrot.lane.b32.xlu1 %v2543_v40, %s2691_s22 }
 0x254   :  { %v243_v42 = vpop.permute.xlu1 %242 }
 0x255   :  { %v245_v43 = vmul.f32 %v2541_v23, %v243_v42 }
 0x257   :  { %247 = vrot.lane.b32.xlu1 %v245_v43, %s2692_s2 }
 0x2c9   :  { %v248_v44 = vpop.permute.xlu1 %247 }
 0x2ca   :  { %v250_v45 = vsel %vm147_vm3, %v248_v44, 0.0  ;;  %2168 = vmatmul.mubr.msk.f32.vlgmr.msra.gmra.mrb[2].mxu1 %vm147_vm3, %v248_v44 }
 0x2cb   :  { %2157 = vmatmul.mubr.msk.f32.vlgmr.msra.gmra.mrb[2].mxu0 %vm251_vm4, %v250_v45  ;;  %2406 = vmatpush3.bf16.msra.mxu1 %v2810_v32 }
 0x2cc   :  { %2407 = vmatprep.subr.bf16.mxu1 %v2688_v3  ;;  %2418 = vmatpush3.bf16.msra.mxu0 %v2754_v4 }
 0x2cd   :  { %2419 = vmatprep.subr.bf16.mxu0 %v2688_v3  ;;  %2186 = vmatprep.mubr.msk.f32.mxu1 %vm2689_vm2, %v2690_v10 }
 0x2ce   :  { %2197 = vmatprep.mubr.msk.f32.mxu0 %vm2689_vm2, %v2690_v10 }
 0x2cf   :  { %2409 = vmatpush3.bf16.msra.mxu1 %v2816_v34 }
 0x2d0   :  { %2410 = vmatprep.subr.bf16.mxu1 %v2688_v3  ;;  %2421 = vmatpush3.bf16.msra.mxu0 %v2771_v9 }
 0x2d1   :  { %2422 = vmatprep.subr.bf16.mxu0 %v2688_v3 }
 0x2d3   :  { %2412 = vmatpush3.bf16.msra.mxu1 %v2826_v37 }
 0x2d4   :  { %2413 = vmatprep.subr.bf16.mxu1 %v2688_v3 }
 0x2d7   :  { %2415 = vmatpush3.bf16.msra.mxu1 %v2837_v41 }
 0x2d8   :  { %2434 = vmatprep.subr.bf16.mxu1 %v2688_v3 }
 0x39d   :  { %v417_v47 = vpop.f32.mrb[2].mxu1 }
 0x39e   :  { %v422_v48 = vrot.slane %v417_v47, 6  ;;  %v321_v49 = vpop.f32.mrb[2].mxu0  ;;  %v2169_v50 = vpop.f32.mrb[3].mxu1 }
 0x39f   :  { %v322_v51 = vadd.f32 %v2865_v46, %v321_v49  ;;  %v2158_v52 = vpop.f32.mrb[3].mxu0 }
 0x3a0   :  { %v424_v53 = vadd.f32 %v422_v48, %v2793_v15 }
 0x3a1   :  { %2544 = vtanh.f32 %v322_v51  ;;  %v1973_v56 = vmul.f32 -1.442695, %v322_v51 }
 0x3a2   :  { %2546 = vtanh.f32 %v424_v53  ;;  %v1975_v57 = vmul.f32 -1.442695, %v424_v53 }
 0x3a3   :  { %2548 = vpow2.f32 %v1973_v56 }
 0x3a4   :  { %2550 = vpow2.f32 %v1975_v57 }
 0x3ab   :  { %v2545_v54 = vpop.eup %2544 }
 0x3ac   :  { %v2547_v55 = vpop.eup %2546  ;;  %334 = vrot.lane.b32.xlu0 %v2545_v54, %s2691_s22 }
 0x3ad   :  { %437 = vrot.lane.b32.xlu1 %v2547_v55, %s2691_s22  ;;  %v2549_v58 = vpop.eup %2548 }
 0x3ae   :  { %v2551_v59 = vpop.eup %2550  ;;  %v328_v60 = vadd.f32 1.0, %v2549_v58 }
 0x3af   :  { %v428_v61 = vadd.f32 1.0, %v2551_v59 }
 0x3b0   :  { %2552 = vrcp.f32 %v328_v60 }
 0x3b1   :  { %2554 = vrcp.f32 %v428_v61 }
 0x3ba   :  { %v2553_v62 = vpop.eup %2552 }
 0x3bb   :  { %v2555_v0 = vpop.eup %2554  ;;  %v332_v7 = vmul.f32 0.0, %v2553_v62 }
 0x3bc   :  { %v435_v11 = vmul.f32 %v2555_v0, %v433_v6 }
 0x41e   :  { %v335_v63 = vpop.permute.xlu0 %334 }
 0x41f   :  { %v337_v1 = vmul.f32 %v2553_v62, %v335_v63  ;;  %v438_v2 = vpop.permute.xlu1 %437 }
 0x420   :  { %v440_v5 = vmul.f32 %v2555_v0, %v438_v2 }
 0x421   :  { %339 = vrot.lane.b32.xlu0 %v337_v1, %s2692_s2 }
 0x422   :  { %442 = vrot.lane.b32.xlu1 %v440_v5, %s2692_s2 }
 0x493   :  { %v340_v8 = vpop.permute.xlu0 %339 }
 0x494   :  { %v2874_v12 = vadd.f32 %v340_v8, %v332_v7  ;;  %v443_v14 = vpop.permute.xlu1 %442 }
 0x495   :  { %v2876_v16 = vadd.f32 %v443_v14, %v435_v11 }
 0x496   :  { %2556 = vtanh.f32 %v2874_v12 }
 0x497   :  { %2558 = vtanh.f32 %v2876_v16  ;;  %v647_v57 = vrot.slane %v2876_v16, 6 }
 0x4a0   :  { %v2557_v17 = vpop.eup %2556 }
 0x4a1   :  { %v2559_v18 = vpop.eup %2558  ;;  %345 = vrot.lane.b32.xlu0 %v2557_v17, %s2691_s22 }
 0x4a2   :  { %448 = vrot.lane.b32.xlu1 %v2559_v18, %s2691_s22 }
 0x513   :  { %v346_v19 = vpop.permute.xlu0 %345 }
 0x514   :  { %v348_v20 = vmul.f32 %v2553_v62, %v346_v19  ;;  %v449_v21 = vpop.permute.xlu1 %448 }
 0x515   :  { %v451_v22 = vmul.f32 %v2555_v0, %v449_v21 }
 0x516   :  { %v457_v23 = vrot.slane %v348_v20, 6 }
 0x517   :  { %453 = vrot.lane.b32.xlu0 %v451_v22, %s2692_s2  ;;  %v560_v24 = vrot.slane %v451_v22, 2 }
 0x518   :  { %458 = vrot.lane.b32.xlu1 %v457_v23, %s2691_s22 }
 0x51b   :  { %561 = vrot.lane.b32.xlu0 %v560_v24, %s2692_s2 }
 0x589   :  { %v454_v25 = vpop.permute.xlu0 %453 }
 0x58a   :  { %v459_v26 = vpop.permute.xlu1 %458 }
 0x58b   :  { %v461_v27 = vsel %vm147_vm3, %v454_v25, %v459_v26 }
 0x58c   :  { %v463_v28 = vrot.slane %v461_v27, 2 }
 0x58d   :  { %v562_v29 = vpop.permute.xlu0 %561 }
 0x58e   :  { %2187 = vmatmul.mubr.msk.f32.vlgmr.msra.gmra.mrb[4].mxu1 %vm251_vm4, %v463_v28  ;;  %2198 = vmatmul.mubr.msk.f32.vlgmr.msra.gmra.mrb[4].mxu0 %vm147_vm3, %v562_v29 }
 0x58f   :  { %2424 = vmatpush3.bf16.msra.mxu0 %v2810_v32  ;;  %2436 = vmatpush3.bf16.msra.mxu1 %v2754_v4 }
 0x590   :  { %2425 = vmatprep.subr.bf16.mxu0 %v2688_v3  ;;  %2437 = vmatprep.subr.bf16.mxu1 %v2688_v3 }
 0x591   :  { %2216 = vmatprep.mubr.msk.f32.mxu0 %vm2689_vm2, %v2690_v10  ;;  %2227 = vmatprep.mubr.msk.f32.mxu1 %vm2689_vm2, %v2690_v10 }
 0x593   :  { %2427 = vmatpush3.bf16.msra.mxu0 %v2816_v34  ;;  %2439 = vmatpush3.bf16.msra.mxu1 %v2771_v9 }
 0x594   :  { %2428 = vmatprep.subr.bf16.mxu0 %v2688_v3  ;;  %2440 = vmatprep.subr.bf16.mxu1 %v2688_v3 }
 0x597   :  { %2430 = vmatpush3.bf16.msra.mxu0 %v2826_v37 }
 0x598   :  { %2431 = vmatprep.subr.bf16.mxu0 %v2688_v3 }
 0x59b   :  { %2433 = vmatpush3.bf16.msra.mxu0 %v2837_v41 }
 0x59c   :  { %2452 = vmatprep.subr.bf16.mxu0 %v2688_v3 }
 0x661   :  { %v532_v30 = vpop.f32.mrb[4].mxu1  ;;  %v631_v31 = vpop.f32.mrb[4].mxu0 }
 0x662   :  { %v533_v33 = vadd.f32 %v2865_v46, %v532_v30  ;;  %v636_v35 = vrot.slane %v631_v31, 4  ;;  %v2188_v36 = vpop.f32.mrb[5].mxu1  ;;  %v2199_v38 = vpop.f32.mrb[5].mxu0 }
 0x664   :  { %2560 = vtanh.f32 %v533_v33  ;;  %v638_v39 = vadd.f32 %v636_v35, %v2793_v15  ;;  %v1977_v43 = vmul.f32 -1.442695, %v533_v33 }
 0x666   :  { %2562 = vtanh.f32 %v638_v39  ;;  %v1979_v44 = vmul.f32 -1.442695, %v638_v39 }
 0x667   :  { %2564 = vpow2.f32 %v1977_v43 }
 0x668   :  { %2566 = vpow2.f32 %v1979_v44 }
 0x66e   :  { %v2561_v40 = vpop.eup %2560 }
 0x66f   :  { %545 = vrot.lane.b32.xlu1 %v2561_v40, %s2691_s22 }
 0x670   :  { %v2563_v42 = vpop.eup %2562 }
 0x671   :  { %651 = vrot.lane.b32.xlu0 %v2563_v42, %s2691_s22  ;;  %v2565_v45 = vpop.eup %2564 }
 0x672   :  { %v2567_v47 = vpop.eup %2566  ;;  %v539_v48 = vadd.f32 1.0, %v2565_v45 }
 0x673   :  { %v642_v49 = vadd.f32 1.0, %v2567_v47 }
 0x674   :  { %2568 = vrcp.f32 %v539_v48 }
 0x675   :  { %2570 = vrcp.f32 %v642_v49 }
 0x67e   :  { %v2569_v50 = vpop.eup %2568 }
 0x67f   :  { %v2571_v53 = vpop.eup %2570  ;;  %v543_v56 = vmul.f32 %v2569_v50, %v2874_v12 }
 0x680   :  { %v649_v60 = vmul.f32 %v2571_v53, %v647_v57 }
 0x6e1   :  { %v546_v51 = vpop.permute.xlu1 %545 }
 0x6e2   :  { %v548_v52 = vmul.f32 %v2569_v50, %v546_v51 }
 0x6e3   :  { %v652_v54 = vpop.permute.xlu0 %651 }
 0x6e4   :  { %550 = vrot.lane.b32.xlu1 %v548_v52, %s2692_s2  ;;  %v654_v55 = vmul.f32 %v2571_v53, %v652_v54 }
 0x6e6   :  { %656 = vrot.lane.b32.xlu0 %v654_v55, %s2692_s2 }
 0x756   :  { %v551_v58 = vpop.permute.xlu1 %550 }
 0x757   :  { %v2912_v59 = vadd.f32 %v551_v58, %v543_v56 }
 0x758   :  { %v657_v61 = vpop.permute.xlu0 %656 }
 0x759   :  { %2572 = vtanh.f32 %v2912_v59  ;;  %v2915_v62 = vadd.f32 %v657_v61, %v649_v60 }
 0x75b   :  { %2574 = vtanh.f32 %v2915_v62  ;;  %v861_v43 = vrot.slane %v2915_v62, 6 }
 0x763   :  { %v2573_v63 = vpop.eup %2572 }
 0x764   :  { %556 = vrot.lane.b32.xlu1 %v2573_v63, %s2691_s22 }
 0x765   :  { %v2575_v0 = vpop.eup %2574 }
 0x766   :  { %662 = vrot.lane.b32.xlu0 %v2575_v0, %s2691_s22 }
 0x7d6   :  { %v557_v1 = vpop.permute.xlu1 %556 }
 0x7d7   :  { %v559_v2 = vmul.f32 %v2569_v50, %v557_v1 }
 0x7d8   :  { %v663_v6 = vpop.permute.xlu0 %662 }
 0x7d9   :  { %v671_v5 = vrot.slane %v559_v2, 4  ;;  %v665_v7 = vmul.f32 %v2571_v53, %v663_v6 }
 0x7db   :  { %672 = vrot.lane.b32.xlu0 %v671_v5, %s2691_s22  ;;  %667 = vrot.lane.b32.xlu1 %v665_v7, %s2692_s2  ;;  %v774_v8 = vrot.slane %v665_v7, 4 }
 0x7df   :  { %775 = vrot.lane.b32.xlu1 %v774_v8, %s2692_s2 }
 0x84d   :  { %v673_v11 = vpop.permute.xlu0 %672  ;;  %v668_v12 = vpop.permute.xlu1 %667 }
 0x84e   :  { %v675_v14 = vsel %vm147_vm3, %v668_v12, %v673_v11 }
 0x84f   :  { %v677_v16 = vrot.slane %v675_v14, 4 }
 0x851   :  { %v776_v17 = vpop.permute.xlu1 %775  ;;  %2217 = vmatmul.mubr.msk.f32.vlgmr.msra.gmra.mrb[6].mxu0 %vm251_vm4, %v677_v16 }
 0x852   :  { %2228 = vmatmul.mubr.msk.f32.vlgmr.msra.gmra.mrb[6].mxu1 %vm147_vm3, %v776_v17  ;;  %2454 = vmatpush3.bf16.msra.mxu0 %v2754_v4 }
 0x853   :  { %2442 = vmatpush3.bf16.msra.mxu1 %v2810_v32  ;;  %2455 = vmatprep.subr.bf16.mxu0 %v2688_v3 }
 0x854   :  { %2443 = vmatprep.subr.bf16.mxu1 %v2688_v3  ;;  %2246 = vmatprep.mubr.msk.f32.mxu1 %vm2689_vm2, %v2690_v10 }
 0x855   :  { %2257 = vmatprep.mubr.msk.f32.mxu0 %vm2689_vm2, %v2690_v10 }
 0x856   :  { %2457 = vmatpush3.bf16.msra.mxu0 %v2771_v9 }
 0x857   :  { %2445 = vmatpush3.bf16.msra.mxu1 %v2816_v34  ;;  %2458 = vmatprep.subr.bf16.mxu0 %v2688_v3 }
 0x858   :  { %2446 = vmatprep.subr.bf16.mxu1 %v2688_v3 }
 0x85b   :  { %2448 = vmatpush3.bf16.msra.mxu1 %v2826_v37 }
 0x85c   :  { %2449 = vmatprep.subr.bf16.mxu1 %v2688_v3 }
 0x85f   :  { %2451 = vmatpush3.bf16.msra.mxu1 %v2837_v41 }
 0x860   :  { %2470 = vmatprep.subr.bf16.mxu1 %v2688_v3 }
 0x924   :  { %v746_v18 = vpop.f32.mrb[6].mxu0 }
 0x925   :  { %v747_v19 = vadd.f32 %v2865_v46, %v746_v18  ;;  %v2218_v20 = vpop.f32.mrb[7].mxu0  ;;  %v845_v21 = vpop.f32.mrb[6].mxu1 }
 0x926   :  { %v850_v22 = vrot.slane %v845_v21, 2  ;;  %v2229_v23 = vpop.f32.mrb[7].mxu1 }
 0x927   :  { %2576 = vtanh.f32 %v747_v19  ;;  %v1981_v27 = vmul.f32 -1.442695, %v747_v19 }
 0x928   :  { %v852_v24 = vadd.f32 %v850_v22, %v2793_v15 }
 0x92a   :  { %2578 = vtanh.f32 %v852_v24  ;;  %v1983_v28 = vmul.f32 -1.442695, %v852_v24 }
 0x92b   :  { %2580 = vpow2.f32 %v1981_v27 }
 0x92c   :  { %2582 = vpow2.f32 %v1983_v28 }
 0x931   :  { %v2577_v25 = vpop.eup %2576 }
 0x932   :  { %759 = vrot.lane.b32.xlu0 %v2577_v25, %s2691_s22 }
 0x934   :  { %v2579_v26 = vpop.eup %2578 }
 0x935   :  { %865 = vrot.lane.b32.xlu1 %v2579_v26, %s2691_s22  ;;  %v2581_v29 = vpop.eup %2580 }
 0x936   :  { %v2583_v30 = vpop.eup %2582  ;;  %v753_v31 = vadd.f32 1.0, %v2581_v29 }
 0x937   :  { %v856_v33 = vadd.f32 1.0, %v2583_v30 }
 0x938   :  { %2584 = vrcp.f32 %v753_v31 }
 0x939   :  { %2586 = vrcp.f32 %v856_v33 }
 0x942   :  { %v2585_v35 = vpop.eup %2584 }
 0x943   :  { %v2587_v38 = vpop.eup %2586  ;;  %v757_v42 = vmul.f32 %v2585_v35, %v2912_v59 }
 0x944   :  { %v863_v47 = vmul.f32 %v2587_v38, %v861_v43 }
 0x9a4   :  { %v760_v36 = vpop.permute.xlu0 %759 }
 0x9a5   :  { %v762_v15 = vmul.f32 %v2585_v35, %v760_v36 }
 0x9a7   :  { %v866_v39 = vpop.permute.xlu1 %865  ;;  %764 = vrot.lane.b32.xlu0 %v762_v15, %s2692_s2 }
 0x9a8   :  { %v868_v40 = vmul.f32 %v2587_v38, %v866_v39 }
 0x9aa   :  { %870 = vrot.lane.b32.xlu1 %v868_v40, %s2692_s2 }
 0xa19   :  { %v765_v44 = vpop.permute.xlu0 %764 }
 0xa1a   :  { %v2950_v45 = vadd.f32 %v765_v44, %v757_v42 }
 0xa1c   :  { %2588 = vtanh.f32 %v2950_v45  ;;  %v871_v48 = vpop.permute.xlu1 %870 }
 0xa1d   :  { %v2953_v49 = vadd.f32 %v871_v48, %v863_v47 }
 0xa1f   :  { %2590 = vtanh.f32 %v2953_v49  ;;  %v1072_v25 = vrot.slane %v2953_v49, 6 }
 0xa26   :  { %v2589_v50 = vpop.eup %2588 }
 0xa27   :  { %770 = vrot.lane.b32.xlu0 %v2589_v50, %s2691_s22 }
 0xa29   :  { %v2591_v51 = vpop.eup %2590 }
 0xa2a   :  { %876 = vrot.lane.b32.xlu1 %v2591_v51, %s2691_s22 }
 0xa99   :  { %v771_v52 = vpop.permute.xlu0 %770 }
 0xa9a   :  { %v773_v53 = vmul.f32 %v2585_v35, %v771_v52 }
 0xa9c   :  { %v885_v54 = vrot.slane %v773_v53, 2  ;;  %v877_v55 = vpop.permute.xlu1 %876 }
 0xa9d   :  { %v879_v56 = vmul.f32 %v2587_v38, %v877_v55 }
 0xa9e   :  { %886 = vrot.lane.b32.xlu1 %v885_v54, %s2691_s22 }
 0xa9f   :  { %881 = vrot.lane.b32.xlu0 %v879_v56, %s2692_s2  ;;  %v988_v57 = vrot.slane %v879_v56, 6 }
 0xaa3   :  { %989 = vrot.lane.b32.xlu0 %v988_v57, %s2692_s2 }
 0xb10   :  { %v887_v58 = vpop.permute.xlu1 %886 }
 0xb11   :  { %v882_v59 = vpop.permute.xlu0 %881 }
 0xb12   :  { %v889_v60 = vsel %vm147_vm3, %v882_v59, %v887_v58 }
 0xb13   :  { %v891_v61 = vrot.slane %v889_v60, 6 }
 0xb15   :  { %2247 = vmatmul.mubr.msk.f32.vlgmr.msra.gmra.mrb[8].mxu1 %vm251_vm4, %v891_v61  ;;  %v990_v62 = vpop.permute.xlu0 %989 }
 0xb16   :  { %2258 = vmatmul.mubr.msk.f32.vlgmr.msra.gmra.mrb[8].mxu0 %vm147_vm3, %v990_v62  ;;  %2472 = vmatpush3.bf16.msra.mxu1 %v2754_v4 }
 0xb17   :  { %2460 = vmatpush3.bf16.msra.mxu0 %v2810_v32  ;;  %2473 = vmatprep.subr.bf16.mxu1 %v2688_v3 }
 0xb18   :  { %2461 = vmatprep.subr.bf16.mxu0 %v2688_v3  ;;  %2287 = vmatprep.mubr.msk.f32.mxu1 %vm2689_vm2, %v2690_v10 }
 0xb19   :  { %2276 = vmatprep.mubr.msk.f32.mxu0 %vm2689_vm2, %v2690_v10 }
 0xb1a   :  { %2475 = vmatpush3.bf16.msra.mxu1 %v2771_v9 }
 0xb1b   :  { %2463 = vmatpush3.bf16.msra.mxu0 %v2816_v34  ;;  %2476 = vmatprep.subr.bf16.mxu1 %v2688_v3 }
 0xb1c   :  { %2464 = vmatprep.subr.bf16.mxu0 %v2688_v3 }
 0xb1f   :  { %2466 = vmatpush3.bf16.msra.mxu0 %v2826_v37 }
 0xb20   :  { %2467 = vmatprep.subr.bf16.mxu0 %v2688_v3 }
 0xb23   :  { %2469 = vmatpush3.bf16.msra.mxu0 %v2837_v41 }
 0xb24   :  { %2488 = vmatprep.subr.bf16.mxu0 %v2688_v3 }
 0xbe8   :  { %v960_v63 = vpop.f32.mrb[8].mxu1 }
 0xbe9   :  { %v961_v0 = vadd.f32 %v2865_v46, %v960_v63  ;;  %v2248_v1 = vpop.f32.mrb[9].mxu1  ;;  %v1059_v2 = vpop.f32.mrb[8].mxu0 }
 0xbea   :  { %v1063_v5 = vadd.f32 %v1059_v2, %v2791_v13  ;;  %v2259_v6 = vpop.f32.mrb[9].mxu0 }
 0xbeb   :  { %2592 = vtanh.f32 %v961_v0  ;;  %v1985_v11 = vmul.f32 -1.442695, %v961_v0 }
 0xbec   :  { %2594 = vtanh.f32 %v1063_v5  ;;  %v1987_v12 = vmul.f32 -1.442695, %v1063_v5 }
 0xbed   :  { %2596 = vpow2.f32 %v1985_v11 }
 0xbee   :  { %2598 = vpow2.f32 %v1987_v12 }
 0xbf5   :  { %v2593_v7 = vpop.eup %2592 }
 0xbf6   :  { %v2595_v8 = vpop.eup %2594  ;;  %973 = vrot.lane.b32.xlu1 %v2593_v7, %s2691_s22 }
 0xbf7   :  { %1076 = vrot.lane.b32.xlu0 %v2595_v8, %s2691_s22  ;;  %v2597_v14 = vpop.eup %2596 }
 0xbf8   :  { %v2599_v16 = vpop.eup %2598  ;;  %v967_v17 = vadd.f32 1.0, %v2597_v14 }
 0xbf9   :  { %v1067_v18 = vadd.f32 1.0, %v2599_v16 }
 0xbfa   :  { %2600 = vrcp.f32 %v967_v17 }
 0xbfb   :  { %2602 = vrcp.f32 %v1067_v18 }
 0xc04   :  { %v2601_v19 = vpop.eup %2600 }
 0xc05   :  { %v2603_v21 = vpop.eup %2602  ;;  %v971_v26 = vmul.f32 %v2601_v19, %v2950_v45 }
 0xc06   :  { %v1074_v28 = vmul.f32 %v2603_v21, %v1072_v25 }
 0xc68   :  { %v974_v20 = vpop.permute.xlu1 %973 }
 0xc69   :  { %v976_v22 = vmul.f32 %v2601_v19, %v974_v20  ;;  %v1077_v23 = vpop.permute.xlu0 %1076 }
 0xc6a   :  { %v1079_v24 = vmul.f32 %v2603_v21, %v1077_v23 }
 0xc6b   :  { %978 = vrot.lane.b32.xlu1 %v976_v22, %s2692_s2 }
 0xc6c   :  { %1081 = vrot.lane.b32.xlu0 %v1079_v24, %s2692_s2 }
 0xcdd   :  { %v979_v27 = vpop.permute.xlu1 %978 }
 0xcde   :  { %v2988_v29 = vadd.f32 %v979_v27, %v971_v26  ;;  %v1082_v30 = vpop.permute.xlu0 %1081 }
 0xcdf   :  { %v2990_v31 = vadd.f32 %v1082_v30, %v1074_v28 }
 0xce0   :  { %2604 = vtanh.f32 %v2988_v29 }
 0xce1   :  { %2606 = vtanh.f32 %v2990_v31  ;;  %v1281_v2 = vrot.slane %v2990_v31, 6 }
 0xcea   :  { %v2605_v33 = vpop.eup %2604 }
 0xceb   :  { %v2607_v35 = vpop.eup %2606  ;;  %984 = vrot.lane.b32.xlu1 %v2605_v33, %s2691_s22 }
 0xcec   :  { %1087 = vrot.lane.b32.xlu0 %v2607_v35, %s2691_s22 }
 0xd5d   :  { %v985_v36 = vpop.permute.xlu1 %984 }
 0xd5e   :  { %v987_v15 = vmul.f32 %v2601_v19, %v985_v36  ;;  %v1088_v38 = vpop.permute.xlu0 %1087 }
 0xd5f   :  { %v1090_v39 = vmul.f32 %v2603_v21, %v1088_v38 }
 0xd60   :  { %1096 = vrot.lane.b32.xlu0 %v987_v15, %s2691_s22 }
 0xd61   :  { %1092 = vrot.lane.b32.xlu1 %v1090_v39, %s2692_s2 }
 0xdd2   :  { %v1097_v40 = vpop.permute.xlu0 %1096 }
 0xdd3   :  { %v1093_v42 = vpop.permute.xlu1 %1092 }
 0xdd4   :  { %v1099_v43 = vsel %vm147_vm3, %v1093_v42, %v1097_v40  ;;  %2288 = vmatmul.mubr.msk.f32.vlgmr.msra.gmra.mrb[10].mxu1 %vm147_vm3, %v1093_v42 }
 0xdd5   :  { %2277 = vmatmul.mubr.msk.f32.vlgmr.msra.gmra.mrb[10].mxu0 %vm251_vm4, %v1099_v43  ;;  %2478 = vmatpush3.bf16.msra.mxu1 %v2810_v32 }
 0xdd6   :  { %2479 = vmatprep.subr.bf16.mxu1 %v2688_v3  ;;  %2490 = vmatpush3.bf16.msra.mxu0 %v2754_v4 }
 0xdd7   :  { %2491 = vmatprep.subr.bf16.mxu0 %v2688_v3  ;;  %2306 = vmatprep.mubr.msk.f32.mxu1 %vm2689_vm2, %v2690_v10 }
 0xdd8   :  { %2317 = vmatprep.mubr.msk.f32.mxu0 %vm2689_vm2, %v2690_v10 }
 0xdd9   :  { %2481 = vmatpush3.bf16.msra.mxu1 %v2816_v34 }
 0xdda   :  { %2482 = vmatprep.subr.bf16.mxu1 %v2688_v3  ;;  %2493 = vmatpush3.bf16.msra.mxu0 %v2771_v9 }
 0xddb   :  { %2494 = vmatprep.subr.bf16.mxu0 %v2688_v3 }
 0xddd   :  { %2484 = vmatpush3.bf16.msra.mxu1 %v2826_v37 }
 0xdde   :  { %2485 = vmatprep.subr.bf16.mxu1 %v2688_v3 }
 0xde1   :  { %2487 = vmatpush3.bf16.msra.mxu1 %v2837_v41 }
 0xde2   :  { %2506 = vmatprep.subr.bf16.mxu1 %v2688_v3 }
 0xea7   :  { %v1265_v44 = vpop.f32.mrb[10].mxu1 }
 0xea8   :  { %v1270_v45 = vrot.slane %v1265_v44, 6  ;;  %v1169_v47 = vpop.f32.mrb[10].mxu0  ;;  %v2289_v48 = vpop.f32.mrb[11].mxu1 }
 0xea9   :  { %v1170_v49 = vadd.f32 %v2865_v46, %v1169_v47  ;;  %v2278_v50 = vpop.f32.mrb[11].mxu0 }
 0xeaa   :  { %v1272_v51 = vadd.f32 %v1270_v45, %v2791_v13 }
 0xeab   :  { %2608 = vtanh.f32 %v1170_v49  ;;  %v1989_v54 = vmul.f32 -1.442695, %v1170_v49 }
 0xeac   :  { %2610 = vtanh.f32 %v1272_v51  ;;  %v1991_v55 = vmul.f32 -1.442695, %v1272_v51 }
 0xead   :  { %2612 = vpow2.f32 %v1989_v54 }
 0xeae   :  { %2614 = vpow2.f32 %v1991_v55 }
 0xeb5   :  { %v2609_v52 = vpop.eup %2608 }
 0xeb6   :  { %v2611_v53 = vpop.eup %2610  ;;  %1182 = vrot.lane.b32.xlu1 %v2609_v52, %s2691_s22 }
 0xeb7   :  { %1285 = vrot.lane.b32.xlu0 %v2611_v53, %s2691_s22  ;;  %v2613_v56 = vpop.eup %2612 }
 0xeb8   :  { %v2615_v57 = vpop.eup %2614  ;;  %v1176_v58 = vadd.f32 1.0, %v2613_v56 }
 0xeb9   :  { %v1276_v59 = vadd.f32 1.0, %v2615_v57 }
 0xeba   :  { %2616 = vrcp.f32 %v1176_v58 }
 0xebb   :  { %2618 = vrcp.f32 %v1276_v59 }
 0xec4   :  { %v2617_v60 = vpop.eup %2616 }
 0xec5   :  { %v2619_v62 = vpop.eup %2618  ;;  %v1180_v5 = vmul.f32 %v2617_v60, %v2988_v29 }
 0xec6   :  { %v1283_v7 = vmul.f32 %v2619_v62, %v1281_v2 }
 0xf28   :  { %v1183_v61 = vpop.permute.xlu1 %1182 }
 0xf29   :  { %v1185_v63 = vmul.f32 %v2617_v60, %v1183_v61  ;;  %v1286_v0 = vpop.permute.xlu0 %1285 }
 0xf2a   :  { %v1288_v1 = vmul.f32 %v2619_v62, %v1286_v0 }
 0xf2b   :  { %1187 = vrot.lane.b32.xlu1 %v1185_v63, %s2692_s2 }
 0xf2c   :  { %1290 = vrot.lane.b32.xlu0 %v1288_v1, %s2692_s2 }
 0xf9d   :  { %v1188_v6 = vpop.permute.xlu1 %1187 }
 0xf9e   :  { %v3025_v8 = vadd.f32 %v1188_v6, %v1180_v5  ;;  %v1291_v11 = vpop.permute.xlu0 %1290 }
 0xf9f   :  { %v3027_v12 = vadd.f32 %v1291_v11, %v1283_v7 }
 0xfa0   :  { %2620 = vtanh.f32 %v3025_v8 }
 0xfa1   :  { %2622 = vtanh.f32 %v3027_v12  ;;  %v1495_v52 = vrot.slane %v3027_v12, 6 }
 0xfaa   :  { %v2621_v14 = vpop.eup %2620 }
 0xfab   :  { %v2623_v16 = vpop.eup %2622  ;;  %1193 = vrot.lane.b32.xlu1 %v2621_v14, %s2691_s22 }
 0xfac   :  { %1296 = vrot.lane.b32.xlu0 %v2623_v16, %s2691_s22 }
0x101d   :  { %v1194_v17 = vpop.permute.xlu1 %1193 }
0x101e   :  { %v1196_v18 = vmul.f32 %v2617_v60, %v1194_v17  ;;  %v1297_v19 = vpop.permute.xlu0 %1296 }
0x101f   :  { %v1299_v20 = vmul.f32 %v2619_v62, %v1297_v19 }
0x1020   :  { %v1305_v21 = vrot.slane %v1196_v18, 6 }
0x1021   :  { %1301 = vrot.lane.b32.xlu1 %v1299_v20, %s2692_s2  ;;  %v1408_v22 = vrot.slane %v1299_v20, 2 }
0x1022   :  { %1306 = vrot.lane.b32.xlu0 %v1305_v21, %s2691_s22 }
0x1025   :  { %1409 = vrot.lane.b32.xlu1 %v1408_v22, %s2692_s2 }
0x1093   :  { %v1302_v23 = vpop.permute.xlu1 %1301 }
0x1094   :  { %v1307_v24 = vpop.permute.xlu0 %1306 }
0x1095   :  { %v1309_v25 = vsel %vm147_vm3, %v1302_v23, %v1307_v24 }
0x1096   :  { %v1311_v26 = vrot.slane %v1309_v25, 2 }
0x1097   :  { %v1410_v27 = vpop.permute.xlu1 %1409 }
0x1098   :  { %2307 = vmatmul.mubr.msk.f32.vlgmr.msra.gmra.mrb[12].mxu1 %vm251_vm4, %v1311_v26  ;;  %2318 = vmatmul.mubr.msk.f32.vlgmr.msra.gmra.mrb[12].mxu0 %vm147_vm3, %v1410_v27 }
0x1099   :  { %2496 = vmatpush3.bf16.msra.mxu0 %v2810_v32  ;;  %2508 = vmatpush3.bf16.msra.mxu1 %v2754_v4 }
0x109a   :  { %2497 = vmatprep.subr.bf16.mxu0 %v2688_v3  ;;  %2509 = vmatprep.subr.bf16.mxu1 %v2688_v3 }
0x109b   :  { %2336 = vmatprep.mubr.msk.f32.mxu0 %vm2689_vm2, %v2690_v10  ;;  %2347 = vmatprep.mubr.msk.f32.mxu1 %vm2689_vm2, %v2690_v10 }
0x109d   :  { %2499 = vmatpush3.bf16.msra.mxu0 %v2816_v34  ;;  %2511 = vmatpush3.bf16.msra.mxu1 %v2771_v9 }
0x109e   :  { %2500 = vmatprep.subr.bf16.mxu0 %v2688_v3  ;;  %2512 = vmatprep.subr.bf16.mxu1 %v2688_v3 }
0x10a1   :  { %2502 = vmatpush3.bf16.msra.mxu0 %v2826_v37 }
0x10a2   :  { %2503 = vmatprep.subr.bf16.mxu0 %v2688_v3 }
0x10a5   :  { %2505 = vmatpush3.bf16.msra.mxu0 %v2837_v41 }
0x10a6   :  { %2524 = vmatprep.subr.bf16.mxu0 %v2688_v3 }
0x116b   :  { %v1380_v4 = vpop.f32.mrb[12].mxu1  ;;  %v1479_v28 = vpop.f32.mrb[12].mxu0 }
0x116c   :  { %v1381_v29 = vadd.f32 %v2865_v46, %v1380_v4  ;;  %v1484_v30 = vrot.slane %v1479_v28, 4  ;;  %v2308_v31 = vpop.f32.mrb[13].mxu1  ;;  %v2319_v33 = vpop.f32.mrb[13].mxu0 }
0x116e   :  { %2624 = vtanh.f32 %v1381_v29  ;;  %v1486_v9 = vadd.f32 %v1484_v30, %v2791_v13  ;;  %v1993_v15 = vmul.f32 -1.442695, %v1381_v29 }
0x1170   :  { %2626 = vtanh.f32 %v1486_v9  ;;  %v1995_v38 = vmul.f32 -1.442695, %v1486_v9 }
0x1171   :  { %2628 = vpow2.f32 %v1993_v15 }
0x1172   :  { %2630 = vpow2.f32 %v1995_v38 }
0x1178   :  { %v2625_v35 = vpop.eup %2624 }
0x1179   :  { %1393 = vrot.lane.b32.xlu0 %v2625_v35, %s2691_s22 }
0x117a   :  { %v2627_v36 = vpop.eup %2626 }
0x117b   :  { %1499 = vrot.lane.b32.xlu1 %v2627_v36, %s2691_s22  ;;  %v2629_v39 = vpop.eup %2628 }
0x117c   :  { %v2631_v40 = vpop.eup %2630  ;;  %v1387_v42 = vadd.f32 1.0, %v2629_v39 }
0x117d   :  { %v1490_v43 = vadd.f32 1.0, %v2631_v40 }
0x117e   :  { %2632 = vrcp.f32 %v1387_v42 }
0x117f   :  { %2634 = vrcp.f32 %v1490_v43 }
0x1188   :  { %v2633_v44 = vpop.eup %2632 }
0x1189   :  { %v2635_v48 = vpop.eup %2634  ;;  %v1391_v51 = vmul.f32 %v2633_v44, %v3025_v8 }
0x118a   :  { %v1497_v55 = vmul.f32 %v2635_v48, %v1495_v52 }
0x11eb   :  { %v1394_v45 = vpop.permute.xlu0 %1393 }
0x11ec   :  { %v1396_v47 = vmul.f32 %v2633_v44, %v1394_v45 }
0x11ed   :  { %v1500_v49 = vpop.permute.xlu1 %1499 }
0x11ee   :  { %1398 = vrot.lane.b32.xlu0 %v1396_v47, %s2692_s2  ;;  %v1502_v50 = vmul.f32 %v2635_v48, %v1500_v49 }
0x11f0   :  { %1504 = vrot.lane.b32.xlu1 %v1502_v50, %s2692_s2 }
0x1260   :  { %v1399_v53 = vpop.permute.xlu0 %1398 }
0x1261   :  { %v3063_v54 = vadd.f32 %v1399_v53, %v1391_v51 }
0x1262   :  { %v1505_v56 = vpop.permute.xlu1 %1504 }
0x1263   :  { %2636 = vtanh.f32 %v3063_v54  ;;  %v3066_v57 = vadd.f32 %v1505_v56, %v1497_v55 }
0x1265   :  { %2638 = vtanh.f32 %v3066_v57  ;;  %v1709_v28 = vrot.slane %v3066_v57, 6 }
0x126d   :  { %v2637_v58 = vpop.eup %2636 }
0x126e   :  { %1404 = vrot.lane.b32.xlu0 %v2637_v58, %s2691_s22 }
0x126f   :  { %v2639_v59 = vpop.eup %2638 }
0x1270   :  { %1510 = vrot.lane.b32.xlu1 %v2639_v59, %s2691_s22 }
0x12e0   :  { %v1405_v60 = vpop.permute.xlu0 %1404 }
0x12e1   :  { %v1407_v61 = vmul.f32 %v2633_v44, %v1405_v60 }
0x12e2   :  { %v1511_v63 = vpop.permute.xlu1 %1510 }
0x12e3   :  { %v1519_v62 = vrot.slane %v1407_v61, 4  ;;  %v1513_v0 = vmul.f32 %v2635_v48, %v1511_v63  ;;  %v1837_v61 = vld [vmem:[%s3150_s6 + $0x8] sm:$0xff] }
0x12e5   :  { %1520 = vrot.lane.b32.xlu1 %v1519_v62, %s2691_s22  ;;  %1515 = vrot.lane.b32.xlu0 %v1513_v0, %s2692_s2  ;;  %v1622_v1 = vrot.slane %v1513_v0, 4  ;;  %v1838_v62 = vld [vmem:[%s3150_s6 + $0x10] sm:$0xff]  ;;  %v1839_v0 = vld [vmem:[%s3150_s6 + $0x18] sm:$0xff] }
0x12e9   :  { %1623 = vrot.lane.b32.xlu0 %v1622_v1, %s2692_s2  ;;  %v2528_v1 = vpack.c.bf16 %v1839_v0, %v1838_v62 }
0x1357   :  { %v1521_v2 = vpop.permute.xlu1 %1520  ;;  %v1516_v5 = vpop.permute.xlu0 %1515 }
0x1358   :  { %v1523_v6 = vsel %vm147_vm3, %v1516_v5, %v1521_v2 }
0x1359   :  { %v1525_v7 = vrot.slane %v1523_v6, 4 }
0x135b   :  { %v1624_v8 = vpop.permute.xlu0 %1623  ;;  %2337 = vmatmul.mubr.msk.f32.vlgmr.msra.gmra.mrb[14].mxu0 %vm251_vm4, %v1525_v7 }
0x135c   :  { %2348 = vmatmul.mubr.msk.f32.vlgmr.msra.gmra.mrb[14].mxu1 %vm147_vm3, %v1624_v8  ;;  %2377 = vmatprep.mubr.msk.f32.mxu0 %vm2689_vm2, %v2690_v10 }
0x135d   :  { %2514 = vmatpush3.bf16.msra.mxu1 %v2810_v32  ;;  %2366 = vmatprep.mubr.msk.f32.mxu1 %vm2689_vm2, %v2690_v10 }
0x135e   :  { %2515 = vmatprep.subr.bf16.mxu1 %v2688_v3 }
0x1361   :  { %2517 = vmatpush3.bf16.msra.mxu1 %v2816_v34 }
0x1362   :  { %2518 = vmatprep.subr.bf16.mxu1 %v2688_v3 }
0x1365   :  { %2520 = vmatpush3.bf16.msra.mxu1 %v2826_v37 }
0x1366   :  { %2521 = vmatprep.subr.bf16.mxu1 %v2688_v3 }
0x1369   :  { %2523 = vmatpush3.bf16.msra.mxu1 %v2837_v41 }
0x142e   :  { %v1594_v11 = vpop.f32.mrb[14].mxu0 }
0x142f   :  { %v1595_v12 = vadd.f32 %v2865_v46, %v1594_v11  ;;  %v2338_v14 = vpop.f32.mrb[15].mxu0  ;;  %v1693_v32 = vpop.f32.mrb[14].mxu1 }
0x1430   :  { %v1698_v16 = vrot.slane %v1693_v32, 2  ;;  %v2349_v17 = vpop.f32.mrb[15].mxu1 }
0x1431   :  { %2640 = vtanh.f32 %v1595_v12  ;;  %v1997_v37 = vmul.f32 -1.442695, %v1595_v12 }
0x1432   :  { %v1700_v10 = vadd.f32 %v1698_v16, %v2791_v13 }
0x1434   :  { %2642 = vtanh.f32 %v1700_v10  ;;  %v1999_v19 = vmul.f32 -1.442695, %v1700_v10 }
0x1435   :  { %2644 = vpow2.f32 %v1997_v37 }
0x1436   :  { %2646 = vpow2.f32 %v1999_v19 }
0x143b   :  { %v2641_v34 = vpop.eup %2640 }
0x143c   :  { %1607 = vrot.lane.b32.xlu1 %v2641_v34, %s2691_s22 }
0x143e   :  { %v2643_v18 = vpop.eup %2642 }
0x143f   :  { %1713 = vrot.lane.b32.xlu0 %v2643_v18, %s2691_s22  ;;  %v2645_v41 = vpop.eup %2644  ;;  %v2002_v18 = vld [vmem:[%s3151_s7] ss:$0 sm:$0xff] }
0x1440   :  { %v2647_v20 = vpop.eup %2646  ;;  %v1601_v21 = vadd.f32 1.0, %v2645_v41 }
0x1441   :  { %v1704_v22 = vadd.f32 1.0, %v2647_v20 }
0x1442   :  { %2648 = vrcp.f32 %v1601_v21 }
0x1443   :  { %2650 = vrcp.f32 %v1704_v22 }
0x144c   :  { %v2649_v23 = vpop.eup %2648 }
0x144d   :  { %v2651_v25 = vpop.eup %2650  ;;  %v1605_v4 = vmul.f32 %v2649_v23, %v3063_v54 }
0x144e   :  { %v1711_v31 = vmul.f32 %v2651_v25, %v1709_v28 }
0x14ae   :  { %v1608_v24 = vpop.permute.xlu1 %1607 }
0x14af   :  { %v1610_v13 = vmul.f32 %v2649_v23, %v1608_v24 }
0x14b1   :  { %v1714_v26 = vpop.permute.xlu0 %1713  ;;  %1612 = vrot.lane.b32.xlu1 %v1610_v13, %s2692_s2 }
0x14b2   :  { %v1716_v27 = vmul.f32 %v2651_v25, %v1714_v26 }
0x14b4   :  { %1718 = vrot.lane.b32.xlu0 %v1716_v27, %s2692_s2 }
0x1523   :  { %v1613_v29 = vpop.permute.xlu1 %1612 }
0x1524   :  { %v1615_v30 = vadd.f32 %v1613_v29, %v1605_v4 }
0x1526   :  { %2652 = vtanh.f32 %v1615_v30  ;;  %v1719_v33 = vpop.permute.xlu0 %1718 }
0x1527   :  { %v1721_v9 = vadd.f32 %v1719_v33, %v1711_v31 }
0x1529   :  { %2654 = vtanh.f32 %v1721_v9  ;;  %v1929_v5 = vrot.slane %v1721_v9, 2 }
0x1530   :  { %v2653_v35 = vpop.eup %2652 }
0x1531   :  { %1618 = vrot.lane.b32.xlu1 %v2653_v35, %s2691_s22 }
0x1533   :  { %v2655_v36 = vpop.eup %2654 }
0x1534   :  { %1724 = vrot.lane.b32.xlu0 %v2655_v36, %s2691_s22 }
0x15a3   :  { %v1619_v15 = vpop.permute.xlu1 %1618 }
0x15a4   :  { %v1621_v38 = vmul.f32 %v2649_v23, %v1619_v15 }
0x15a6   :  { %v1733_v39 = vrot.slane %v1621_v38, 2  ;;  %v1725_v40 = vpop.permute.xlu0 %1724 }
0x15a7   :  { %v1727_v42 = vmul.f32 %v2651_v25, %v1725_v40 }
0x15a8   :  { %1734 = vrot.lane.b32.xlu0 %v1733_v39, %s2691_s22 }
0x15a9   :  { %1729 = vrot.lane.b32.xlu1 %v1727_v42, %s2692_s2  ;;  %v1924_v8 = vrot.slane %v1727_v42, 6 }
0x161a   :  { %v1735_v43 = vpop.permute.xlu0 %1734 }
0x161b   :  { %v1730_v44 = vpop.permute.xlu1 %1729 }
0x161c   :  { %v1737_v45 = vsel %vm147_vm3, %v1730_v44, %v1735_v43 }
0x161d   :  { %v1739_v47 = vrot.slane %v1737_v45, 6 }
0x161f   :  { %2367 = vmatmul.mubr.msk.f32.vlgmr.msra.gmra.mrb[16].mxu1 %vm251_vm4, %v1739_v47 }
0x16f2   :  { %v1808_v48 = vpop.f32.mrb[16].mxu1 }
0x16f3   :  { %v1809_v49 = vadd.f32 %v2865_v46, %v1808_v48  ;;  %v2368_v50 = vpop.f32.mrb[17].mxu1  ;;  %v1836_v46 = vld [vmem:[%s3150_s6] sm:$0xff] }
0x16f4   :  { %v2525_v63 = vpack.c.bf16 %v1837_v61, %v1836_v46 }
0x16f5   :  { %2656 = vtanh.f32 %v1809_v49  ;;  %v2001_v52 = vmul.f32 -1.442695, %v1809_v49 }
0x16f6   :  { %2526 = vmatpush3.bf16.msra.mxu0 %v2525_v63 }
0x16f7   :  { %2658 = vpow2.f32 %v2001_v52  ;;  %2527 = vmatprep.subr.bf16.mxu0 %v2688_v3 }
0x16fa   :  { %2529 = vmatpush3.bf16.msra.mxu0 %v2528_v1 }
0x16ff   :  { %v2657_v51 = vpop.eup %2656 }
0x1700   :  { %1821 = vrot.lane.b32.xlu1 %v2657_v51, %s2691_s22 }
0x1701   :  { %v2659_v53 = vpop.eup %2658 }
0x1702   :  { %v1815_v54 = vadd.f32 1.0, %v2659_v53 }
0x1704   :  { %2660 = vrcp.f32 %v1815_v54 }
0x170e   :  { %v2661_v55 = vpop.eup %2660 }
0x170f   :  { %v1819_v58 = vmul.f32 %v2661_v55, %v1615_v30 }
0x1772   :  { %v1822_v56 = vpop.permute.xlu1 %1821 }
0x1773   :  { %v1824_v57 = vmul.f32 %v2661_v55, %v1822_v56 }
0x1775   :  { %1826 = vrot.lane.b32.xlu0 %v1824_v57, %s2692_s2 }
0x17e7   :  { %v1827_v59 = vpop.permute.xlu0 %1826 }
0x17e8   :  { %v1829_v60 = vadd.f32 %v1827_v59, %v1819_v58 }
0x17ea   :  { %2662 = vtanh.f32 %v1829_v60  ;;  %v1934_v12 = vrot.slane %v1829_v60, 2 }
0x17f4   :  { %v2663_v2 = vpop.eup %2662 }
0x17f5   :  { %1832 = vrot.lane.b32.xlu1 %v2663_v2, %s2691_s22 }
0x17f9   :  { %1930 = vrot.lane.b32.xlu1 %v1929_v5, %s2691_s22 }
0x1867   :  { %v1833_v6 = vpop.permute.xlu1 %1832 }
0x1868   :  { %v1835_v7 = vmul.f32 %v2661_v55, %v1833_v6 }
0x186a   :  { %v1926_v11 = vrot.slane %v1835_v7, 6  ;;  %1848 = vrot.lane.b32.xlu0 %v1835_v7, %s2692_s2 }
0x186b   :  { %v1931_v3 = vpop.permute.xlu1 %1930 }
0x186c   :  { %v1939_v14 = vsel %vm1938_vm5, %v1924_v8, %v1926_v11 }
0x186d   :  { %v1940_v16 = vsel %vm49_vm0, %v1939_v14, %v1931_v3 }
0x186e   :  { %1935 = vrot.lane.b32.xlu0 %v1934_v12, %s2691_s22  ;;  %s2693_s22 = smov [#allocation2]  }
0x186f   :  { %s1954_s27 = sshll.u32 %s2693_s22, 4  ;;  %s1955_s27 = int_to_ptr.vmem [resolvable:$true] %s1954_s27 }
0x1870   :  { %s2664_s28 = scalar_lea.vmem %s1955_s27, 32  ;;  %p2669_p1 = scmp.lt.s32.totalorder %s1955_s27, %s1955_s27 }
0x1871   :  { %p2665_p0 = scmp.ne.s32.totalorder %s1955_s27, %s2664_s28  ;;  %p2670_p2 = scmp.lt.s32.totalorder %s2664_s28, %s2664_s28 }
0x1873   :  { %p2671_p3 = por %p2670_p2, %p2669_p1 }
0x1875   :  { %p2672_p4 = pnand %p2671_p3, %p2665_p0 }
0x18dc   :  { %v1849_v32 = vpop.permute.xlu0 %1848 }
0x18dd   :  { %2378 = vmatmul.mubr.msk.f32.vlgmr.msra.gmra.mrb[16].mxu0 %vm147_vm3, %v1849_v32 }
0x18e0   :  { %v1936_v17 = vpop.permute.xlu0 %1935 }
0x18e1   :  { %v1942_v10 = vsel %vm1941_vm6, %v1940_v16, %v1936_v17 }
0x18e2   :  { %1944 = vrot.lane.b32.xlu1 %v1942_v10, %s2692_s2 }
0x1954   :  { %v1945_v34 = vpop.permute.xlu1 %1944 }
0x1955   :  { %1947 = vst.msk [vmem:[%s3153_s9] sm:$0xff] %vm147_vm3, %v1945_v34 }
0x19b0   :  { %v1918_v37 = vpop.f32.mrb[16].mxu0 }
0x19b1   :  { %v1919_v19 = vadd.f32 %v2002_v18, %v1918_v37  ;;  %v2379_v41 = vpop.f32.mrb[17].mxu0 }
0x19b3   :  { %1923 = vst.msk [vmem:[#allocation2] sm:$0x3] %vm1922_vm7, %v1919_v19 }
0x19b4   :  { %2675 = shalt.err (!%p2672_p4)
}
0x19b5   :  { %s2676_s29 = scalar_lea.hbm %s3152_s8, 32 }
0x19b6   :  { %p2677_p5 = scmp.ne.s32.totalorder %s3152_s8, %s2676_s29  ;;  %p2680_p6 = scmp.lt.u32.totalorder %s2676_s29, %s3152_s8 }
0x19b8   :  { %p2682_p7 = pnand %p2680_p6, %p2677_p5 }
0x19ba   :  { %2685 = shalt.err (!%p2682_p7)
}
0x19bb   :  { %1957 = dma.vmem_to_hbm [thread:$0]  %s1955_s27, 32, %s3152_s8, [#allocation3]  }
0x19bc   :  { %2686 = dma.done.wait [#allocation3], 32  }
0x19bd   :  { %2687 = vsyncadd [#allocation3], 4294967264 }
0x19be   :  { %1965 = vsyncpa [#allocation3], 1 }

</bundles_post_ra>
